<compile_context>
chip_gen: v7x
topology: tpu7x:2x2x1
jax: 0.10.0
libtpu: 0.0.40
codegen_flags: <defaults>
</compile_context>

<pallas_src>
import math
import functools

import jax
import jax.numpy as jnp
from jax import lax
from jax.experimental import pallas as pl
from jax.experimental.pallas import tpu as pltpu


# --------------------------------------------------------------------------- #
# Static layout configuration.
#
# Each image's zero-padded spatial plane (Hp*Wp pixels) is flattened onto the
# lane axis; images of a chunk are packed back-to-back (no inter-image guard is
# needed: interior outputs only ever read their own image's padded region, and
# padding-ring positions are masked to zero before conv2 / discarded at the
# end).  A zero margin of Y0 lanes on the left and (Y0) on the right keeps all
# shifted tap slices in-bounds.
# --------------------------------------------------------------------------- #
def _round_up(x, m):
    return (x + m - 1) // m * m


def _conv_cfg(H, W):
    Hp, Wp = H + 2, W + 2                      # zero-padded spatial dims
    hpwp = Hp * Wp                             # flattened padded plane size
    maxoff = Wp + 1                            # largest |tap offset|
    g = _round_up(maxoff, 8)                   # conv1->conv2 halo
    Y0 = _round_up(g + maxoff, 128)            # left/right zero margin (lane aligned)
    # Tap offsets in flattened padded coords, tap index = dh*3 + dw.
    offs = tuple((dh - 1) * Wp + (dw - 1) for dh in range(3) for dw in range(3))
    return dict(Hp=Hp, Wp=Wp, hpwp=hpwp, maxoff=maxoff, g=g, Y0=Y0, offs=offs)


def _chunk_dims(cfg, NB):
    """Lane widths for a chunk of NB images: output / conv1-intermediate / input."""
    WY = _round_up(NB * cfg["hpwp"], 128)      # lane-dense output width
    WH = WY + 2 * cfg["g"]                     # conv1 output window (with halo)
    WT = WY + 2 * cfg["Y0"]                    # total input lane width
    return WY, WH, WT


def _images_per_step(N, hpwp, target_lanes=2048):
    """Pack several images per grid step so per-step overhead is amortized."""
    return max(1, min(N, target_lanes // max(hpwp, 1)))


def _taps(w):
    """[Cout, Cin, 3, 3] -> [9, Cout, Cin] with tap index = dh*3 + dw."""
    cout, cin = w.shape[0], w.shape[1]
    return w.transpose(2, 3, 0, 1).reshape(9, cout, cin)


def _pack_batch_on_lanes(x, cfg, NB, G, WT):
    """[N, C, H, W] -> bf16 [G, C, WT]: each chunk holds NB zero-padded images
    flattened back-to-back on the lane axis, starting at lane Y0."""
    N, C, H, W = x.shape
    hpwp, Y0 = cfg["hpwp"], cfg["Y0"]
    Npad = G * NB
    xp = jnp.pad(x, ((0, Npad - N), (0, 0), (1, 1), (1, 1)))
    xf = xp.reshape(G, NB, C, hpwp).transpose(0, 2, 1, 3).reshape(G, C, NB * hpwp)
    xf = jnp.pad(xf, ((0, 0), (0, 0), (Y0, WT - Y0 - NB * hpwp)))
    return xf.astype(jnp.bfloat16)


def _interior_mask(cfg, NB, WH):
    """mask[j] = 1 where column j of the conv1 window is an interior (non-padding)
    pixel of some image, else 0."""
    Hp, Wp, hpwp, g = cfg["Hp"], cfg["Wp"], cfg["hpwp"], cfg["g"]
    H, W = Hp - 2, Wp - 2
    j = jnp.arange(WH)
    rel = j - g
    q = jnp.where(rel >= 0, rel, 0) % hpwp
    hh, ww = q // Wp, q % Wp
    ok = (rel >= 0) & (rel < NB * hpwp) & (hh >= 1) & (hh <= H) & (ww >= 1) & (ww <= W)
    return ok.astype(jnp.float32).reshape(1, WH)


def _unpack_output(y, cfg, NB, N, H, W):
    """[G, C, WY] packed-lane output -> [N, C, H, W] (drop margins / padding ring)."""
    G, C, _ = y.shape
    Hp, Wp, hpwp = cfg["Hp"], cfg["Wp"], cfg["hpwp"]
    y = y[:, :, :NB * hpwp].reshape(G, C, NB, Hp, Wp)
    y = y.transpose(0, 2, 1, 3, 4).reshape(G * NB, C, Hp, Wp)
    return y[:N, :, 1:H + 1, 1:W + 1]


def _vmem_limit_bytes(cin, cmid, cout, WT, WH, WY):
    est = (2 * cin * WT * 2                              # double-buffered bf16 input block
           + 2 * cout * WY * 4                           # double-buffered f32 output block
           + 2 * 9 * (cmid * cin + cout * cmid) * 2      # resident bf16 tap weights
           + 2 * (cmid + cout) * 4 + 2 * WH * 4          # biases + mask
           + cmid * WH * 6 + cout * WY * 4)              # f32 acc + bf16 h + f32 acc2
    return int(min(max(2 * est, 16 << 20), 64 << 20))


# --------------------------------------------------------------------------- #
# Pallas kernels
# --------------------------------------------------------------------------- #
def _conv_taps_acc(src, w_ref, base, width, offs):
    """In-kernel im2col as 9 shifted lane slices + MXU matmuls, f32 accumulation.
    src is already bf16 (no per-tap casts).  out[:, j] = sum_t w[t] @ src[:, base+off_t+j]."""
    acc = None
    for t, off in enumerate(offs):
        s = base + off                                     # static slice start
        d = jnp.dot(w_ref[t], src[:, s:s + width],
                    preferred_element_type=jnp.float32)
        acc = d if acc is None else acc + d
    return acc


def _make_fused_kernel(offs, x_base, h_base, WH, WY):
    def kernel(x_ref, w1_ref, b1_ref, m_ref, w2_ref, b2_ref, o_ref):
        x = x_ref[0]                                       # [Cin, WT]  bf16
        # conv1 + bias + ReLU over a haloed window so conv2 can re-slice it.
        h = _conv_taps_acc(x, w1_ref, x_base, WH, offs) + b1_ref[...]
        h = (jnp.maximum(h, 0.0) * m_ref[...]).astype(jnp.bfloat16)   # single cast
        # conv2 + bias + sigmoid, lane-dense [Cout, WY] store.
        y = _conv_taps_acc(h, w2_ref, h_base, WY, offs) + b2_ref[...]
        o_ref[0] = pl.reciprocal(1.0 + jnp.exp(-y), approx=True)      # EUP, no VPU divide
    return kernel


def _make_conv_kernel(offs, base, WY, act):
    def kernel(x_ref, w_ref, b_ref, o_ref):
        y = _conv_taps_acc(x_ref[0], w_ref, base, WY, offs) + b_ref[...]
        if act == "relu":
            y = jnp.maximum(y, 0.0)
        elif act == "sigmoid":
            y = pl.reciprocal(1.0 + jnp.exp(-y), approx=True)
        o_ref[0] = y
    return kernel


def _relu_body(x_ref, o_ref):
    o_ref[...] = jnp.maximum(x_ref[...], 0.0)


def _sigmoid_body(x_ref, o_ref):
    o_ref[...] = pl.reciprocal(1.0 + jnp.exp(-x_ref[...]), approx=True)


# --------------------------------------------------------------------------- #
# pallas_call wrappers
# --------------------------------------------------------------------------- #
@jax.jit
def _fused_conv_relu_conv_sigmoid(x, w1, b1, w2, b2):
    N, Cin, H, W = x.shape
    Cmid, Cout = w1.shape[0], w2.shape[0]
    cfg = _conv_cfg(H, W)
    NB = _images_per_step(N, cfg["hpwp"])
    G = -(-N // NB)
    WY, WH, WT = _chunk_dims(cfg, NB)

    x_flat = _pack_batch_on_lanes(x, cfg, NB, G, WT)       # bf16 once, in the wrapper
    w1_t = _taps(w1).astype(jnp.bfloat16)
    w2_t = _taps(w2).astype(jnp.bfloat16)
    b1c, b2c = b1.reshape(Cmid, 1), b2.reshape(Cout, 1)
    mask = _interior_mask(cfg, NB, WH)

    y = pl.pallas_call(
        _make_fused_kernel(cfg["offs"], cfg["Y0"] - cfg["g"], cfg["g"], WH, WY),
        out_shape=jax.ShapeDtypeStruct((G, Cout, WY), jnp.float32),
        grid=(G,),
        in_specs=[
            pl.BlockSpec((1, Cin, WT), lambda n: (n, 0, 0)),      # per-chunk input
            pl.BlockSpec((9, Cmid, Cin), lambda n: (0, 0, 0)),    # resident bf16 weights
            pl.BlockSpec((Cmid, 1), lambda n: (0, 0)),            # resident bias
            pl.BlockSpec((1, WH), lambda n: (0, 0)),              # resident padding mask
            pl.BlockSpec((9, Cout, Cmid), lambda n: (0, 0, 0)),
            pl.BlockSpec((Cout, 1), lambda n: (0, 0)),
        ],
        out_specs=pl.BlockSpec((1, Cout, WY), lambda n: (n, 0, 0)),
        compiler_params=pltpu.CompilerParams(
            dimension_semantics=("parallel",),
            vmem_limit_bytes=_vmem_limit_bytes(Cin, Cmid, Cout, WT, WH, WY)),
    )(x_flat, w1_t, b1c, mask, w2_t, b2c)
    return _unpack_output(y, cfg, NB, N, H, W)


@functools.partial(jax.jit, static_argnames=("act",))
def _conv3x3_forward(x, w, b, act=None):
    """Single conv + bias (+ fused activation epilogue) for the generic path."""
    N, Cin, H, W = x.shape
    Cout = w.shape[0]
    cfg = _conv_cfg(H, W)
    NB = _images_per_step(N, cfg["hpwp"])
    G = -(-N // NB)
    WY, WH, WT = _chunk_dims(cfg, NB)
    y = pl.pallas_call(
        _make_conv_kernel(cfg["offs"], cfg["Y0"], WY, act),
        out_shape=jax.ShapeDtypeStruct((G, Cout, WY), jnp.float32),
        grid=(G,),
        in_specs=[
            pl.BlockSpec((1, Cin, WT), lambda n: (n, 0, 0)),
            pl.BlockSpec((9, Cout, Cin), lambda n: (0, 0, 0)),
            pl.BlockSpec((Cout, 1), lambda n: (0, 0)),
        ],
        out_specs=pl.BlockSpec((1, Cout, WY), lambda n: (n, 0, 0)),
        compiler_params=pltpu.CompilerParams(
            dimension_semantics=("parallel",),
            vmem_limit_bytes=_vmem_limit_bytes(Cin, max(Cin, Cout), Cout, WT, WH, WY)),
    )(_pack_batch_on_lanes(x, cfg, NB, G, WT),
      _taps(w).astype(jnp.bfloat16), b.reshape(Cout, 1))
    return _unpack_output(y, cfg, NB, N, H, W)


def _eltwise_pallas(body, x):
    """Tiled, lane+sublane-dense standalone activation (the Sequential fast path
    fuses activations into conv epilogues, so this is only a fallback)."""
    n = x.size
    rows_per_blk, lane = 256, 128
    blk = rows_per_blk * lane
    npad = _round_up(n, blk)
    flat = jnp.pad(x.reshape(-1), (0, npad - n)).reshape(npad // lane, lane)
    out = pl.pallas_call(
        body,
        out_shape=jax.ShapeDtypeStruct(flat.shape, x.dtype),
        grid=(flat.shape[0] // rows_per_blk,),
        in_specs=[pl.BlockSpec((rows_per_blk, lane), lambda i: (i, 0))],
        out_specs=pl.BlockSpec((rows_per_blk, lane), lambda i: (i, 0)),
        compiler_params=pltpu.CompilerParams(dimension_semantics=("parallel",)),
    )(flat)
    return out.reshape(-1)[:n].reshape(x.shape)


# --------------------------------------------------------------------------- #
# Module framework mirroring the PyTorch reference
# --------------------------------------------------------------------------- #
class Module:
    def forward(self, *x):
        raise NotImplementedError

    def backward(self, *upstream_derivative):
        raise NotImplementedError  # TODO(synk): backward pass not required here

    def param(self):
        return []

    def zero_grad(self):
        return


class Conv2d(Module):
    """3x3 'same'-padded conv, stride 1; Pallas in-kernel im2col + MXU GEMM with a
    fused bias/activation epilogue."""

    def __init__(self, cin, cout, ksize=3, padding=1, *, key):
        assert ksize == 3 and padding == 1, "kernel specialised to 3x3 / pad=1"
        self.cin, self.cout, self.k, self.pad = cin, cout, ksize, padding
        bound = 1.0 / math.sqrt(cin * ksize * ksize)     # PyTorch Conv2d init
        wk, bk = jax.random.split(key)
        self.weight = jax.random.uniform(wk, (cout, cin, ksize, ksize),
                                         jnp.float32, -bound, bound)
        self.bias = jax.random.uniform(bk, (cout,), jnp.float32, -bound, bound)

    def forward(self, x, act=None):
        return _conv3x3_forward(x, self.weight, self.bias, act=act)

    def param(self):
        return [self.weight, self.bias]


class ReLU(Module):
    def forward(self, x):
        return _eltwise_pallas(_relu_body, x)


class Sigmoid(Module):
    def forward(self, x):
        return _eltwise_pallas(_sigmoid_body, x)


class Sequential(Module):
    def __init__(self, *args):
        super().__init__()
        self.modules = []
        for module in args:
            self.modules.append(module)

    def forward(self, x):
        self.x = x
        mods = self.modules
        # Fully fused fast path: Conv2d -> ReLU -> Conv2d -> Sigmoid in ONE pallas_call.
        if (len(mods) == 4
                and isinstance(mods[0], Conv2d) and isinstance(mods[1], ReLU)
                and isinstance(mods[2], Conv2d) and isinstance(mods[3], Sigmoid)):
            return _fused_conv_relu_conv_sigmoid(
                x, mods[0].weight, mods[0].bias, mods[2].weight, mods[2].bias)
        # Generic path: fuse each activation into the preceding conv's epilogue.
        i = 0
        while i < len(mods):
            m = mods[i]
            if (isinstance(m, Conv2d) and i + 1 < len(mods)
                    and isinstance(mods[i + 1], (ReLU, Sigmoid))):
                act = "relu" if isinstance(mods[i + 1], ReLU) else "sigmoid"
                x = m.forward(x, act=act)
                i += 2
            else:
                x = m.forward(x)
                i += 1
        return x

    def backward(self, gradout):
        reversed_modules = self.modules[::-1]
        out = gradout
        for m in reversed_modules:
            out = m.backward(out)
        return out

    def param(self):
        param = []
        for m in self.modules:
            param.extend(m.param())
        return param

    def zero_grad(self):
        for m in self.modules:
            m.zero_grad()

    def add_module(self, ind, module):
        self.ind = module
        self.modules.append(self.ind)
        return module


# --------------------------------------------------------------------------- #
def _reference(x, w1, b1, w2, b2):
    dn = ("NCHW", "OIHW", "NCHW")
    h = lax.conv_general_dilated(x, w1, (1, 1), "SAME", dimension_numbers=dn)
    h = jnp.maximum(h + b1[None, :, None, None], 0.0)
    y = lax.conv_general_dilated(h, w2, (1, 1), "SAME", dimension_numbers=dn)
    return jax.nn.sigmoid(y + b2[None, :, None, None])


if __name__ == "__main__":
    key = jax.random.PRNGKey(0)
    kx, k1, k2 = jax.random.split(key, 3)

    x = jax.random.normal(kx, (2, 4, 16, 16), jnp.float32)      # NCHW

    model = Sequential(
        Conv2d(4, 8, ksize=3, padding=1, key=k1),
        ReLU(),
        Conv2d(8, 4, ksize=3, padding=1, key=k2),
        Sigmoid(),
    )

    y = model.forward(x)
    jax.block_until_ready(y)

    assert y.shape == (2, 4, 16, 16)
    assert bool(jnp.all(jnp.isfinite(y)))

    ref = _reference(x, model.modules[0].weight, model.modules[0].bias,
                     model.modules[2].weight, model.modules[2].bias)
    err = float(jnp.max(jnp.abs(y - ref)))
    assert err < 5e-2, f"mismatch vs XLA reference: max abs err = {err}"

    print("KERNEL_OK")
</pallas_src>

<mosaic_0001>
module attributes {stable_mosaic.version = 11 : i64} {
  func.func @kernel(%arg0: i32, %arg1: memref<1x4x1024xbf16, #tpu.memory_space<vmem>>, %arg2: memref<9x8x4xbf16, #tpu.memory_space<vmem>>, %arg3: memref<8x1xf32, #tpu.memory_space<vmem>>, %arg4: memref<1x816xf32, #tpu.memory_space<vmem>>, %arg5: memref<9x4x8xbf16, #tpu.memory_space<vmem>>, %arg6: memref<4x1xf32, #tpu.memory_space<vmem>>, %arg7: memref<1x4x768xf32, #tpu.memory_space<vmem>>) attributes {dimension_semantics = [#tpu.dimension_semantics<parallel>], iteration_bounds = array<i64: 1>, scalar_prefetch = 0 : i64, scratch_operands = 0 : i64, tpu.core_type = #tpu.core_type<tc>, window_params = [{transform_indices = @transform_0, window_bounds = array<i64: 1, 4, 1024>}, {pipeline_mode = #tpu.pipeline_mode<synchronous>, transform_indices = @transform_1, window_bounds = array<i64: 9, 8, 4>}, {pipeline_mode = #tpu.pipeline_mode<synchronous>, transform_indices = @transform_2, window_bounds = array<i64: 8, 1>}, {pipeline_mode = #tpu.pipeline_mode<synchronous>, transform_indices = @transform_3, window_bounds = array<i64: 1, 816>}, {pipeline_mode = #tpu.pipeline_mode<synchronous>, transform_indices = @transform_4, window_bounds = array<i64: 9, 4, 8>}, {pipeline_mode = #tpu.pipeline_mode<synchronous>, transform_indices = @transform_5, window_bounds = array<i64: 4, 1>}, {transform_indices = @transform_6, window_bounds = array<i64: 1, 4, 768>}]} {
    %c0 = arith.constant 0 : index
    %c0_0 = arith.constant 0 : index
    %c0_1 = arith.constant 0 : index
    %0 = vector.load %arg1[%c0, %c0_0, %c0_1] : memref<1x4x1024xbf16, #tpu.memory_space<vmem>>, vector<1x4x1024xbf16>
    %1 = vector.shape_cast %0 : vector<1x4x1024xbf16> to vector<4x1024xbf16>
    %c0_2 = arith.constant 0 : index
    %c0_3 = arith.constant 0 : index
    %c0_4 = arith.constant 0 : index
    %2 = vector.load %arg2[%c0_2, %c0_3, %c0_4] : memref<9x8x4xbf16, #tpu.memory_space<vmem>>, vector<1x8x4xbf16>
    %3 = vector.shape_cast %2 : vector<1x8x4xbf16> to vector<8x4xbf16>
    %4 = vector.extract_strided_slice %1 {offsets = [0, 85], sizes = [4, 816], strides = [1, 1]} : vector<4x1024xbf16> to vector<4x816xbf16>
    %cst = arith.constant dense<0.000000e+00> : vector<8x816xf32>
    %5 = tpu.matmul %3, %4, %cst {dimension_numbers = #tpu.dot_dimension_numbers<[1], [0], [0], [1], [0, 0, 1, 1], [], []>} : vector<8x4xbf16>, vector<4x816xbf16>, vector<8x816xf32> -> vector<8x816xf32>
    %c1 = arith.constant 1 : index
    %c0_5 = arith.constant 0 : index
    %c0_6 = arith.constant 0 : index
    %6 = vector.load %arg2[%c1, %c0_5, %c0_6] : memref<9x8x4xbf16, #tpu.memory_space<vmem>>, vector<1x8x4xbf16>
    %7 = vector.shape_cast %6 : vector<1x8x4xbf16> to vector<8x4xbf16>
    %8 = vector.extract_strided_slice %1 {offsets = [0, 86], sizes = [4, 816], strides = [1, 1]} : vector<4x1024xbf16> to vector<4x816xbf16>
    %cst_7 = arith.constant dense<0.000000e+00> : vector<8x816xf32>
    %9 = tpu.matmul %7, %8, %cst_7 {dimension_numbers = #tpu.dot_dimension_numbers<[1], [0], [0], [1], [0, 0, 1, 1], [], []>} : vector<8x4xbf16>, vector<4x816xbf16>, vector<8x816xf32> -> vector<8x816xf32>
    %10 = arith.addf %5, %9 : vector<8x816xf32>
    %c2 = arith.constant 2 : index
    %c0_8 = arith.constant 0 : index
    %c0_9 = arith.constant 0 : index
    %11 = vector.load %arg2[%c2, %c0_8, %c0_9] : memref<9x8x4xbf16, #tpu.memory_space<vmem>>, vector<1x8x4xbf16>
    %12 = vector.shape_cast %11 : vector<1x8x4xbf16> to vector<8x4xbf16>
    %13 = vector.extract_strided_slice %1 {offsets = [0, 87], sizes = [4, 816], strides = [1, 1]} : vector<4x1024xbf16> to vector<4x816xbf16>
    %cst_10 = arith.constant dense<0.000000e+00> : vector<8x816xf32>
    %14 = tpu.matmul %12, %13, %cst_10 {dimension_numbers = #tpu.dot_dimension_numbers<[1], [0], [0], [1], [0, 0, 1, 1], [], []>} : vector<8x4xbf16>, vector<4x816xbf16>, vector<8x816xf32> -> vector<8x816xf32>
    %15 = arith.addf %10, %14 : vector<8x816xf32>
    %c3 = arith.constant 3 : index
    %c0_11 = arith.constant 0 : index
    %c0_12 = arith.constant 0 : index
    %16 = vector.load %arg2[%c3, %c0_11, %c0_12] : memref<9x8x4xbf16, #tpu.memory_space<vmem>>, vector<1x8x4xbf16>
    %17 = vector.shape_cast %16 : vector<1x8x4xbf16> to vector<8x4xbf16>
    %18 = vector.extract_strided_slice %1 {offsets = [0, 103], sizes = [4, 816], strides = [1, 1]} : vector<4x1024xbf16> to vector<4x816xbf16>
    %cst_13 = arith.constant dense<0.000000e+00> : vector<8x816xf32>
    %19 = tpu.matmul %17, %18, %cst_13 {dimension_numbers = #tpu.dot_dimension_numbers<[1], [0], [0], [1], [0, 0, 1, 1], [], []>} : vector<8x4xbf16>, vector<4x816xbf16>, vector<8x816xf32> -> vector<8x816xf32>
    %20 = arith.addf %15, %19 : vector<8x816xf32>
    %c4 = arith.constant 4 : index
    %c0_14 = arith.constant 0 : index
    %c0_15 = arith.constant 0 : index
    %21 = vector.load %arg2[%c4, %c0_14, %c0_15] : memref<9x8x4xbf16, #tpu.memory_space<vmem>>, vector<1x8x4xbf16>
    %22 = vector.shape_cast %21 : vector<1x8x4xbf16> to vector<8x4xbf16>
    %23 = vector.extract_strided_slice %1 {offsets = [0, 104], sizes = [4, 816], strides = [1, 1]} : vector<4x1024xbf16> to vector<4x816xbf16>
    %cst_16 = arith.constant dense<0.000000e+00> : vector<8x816xf32>
    %24 = tpu.matmul %22, %23, %cst_16 {dimension_numbers = #tpu.dot_dimension_numbers<[1], [0], [0], [1], [0, 0, 1, 1], [], []>} : vector<8x4xbf16>, vector<4x816xbf16>, vector<8x816xf32> -> vector<8x816xf32>
    %25 = arith.addf %20, %24 : vector<8x816xf32>
    %c5 = arith.constant 5 : index
    %c0_17 = arith.constant 0 : index
    %c0_18 = arith.constant 0 : index
    %26 = vector.load %arg2[%c5, %c0_17, %c0_18] : memref<9x8x4xbf16, #tpu.memory_space<vmem>>, vector<1x8x4xbf16>
    %27 = vector.shape_cast %26 : vector<1x8x4xbf16> to vector<8x4xbf16>
    %28 = vector.extract_strided_slice %1 {offsets = [0, 105], sizes = [4, 816], strides = [1, 1]} : vector<4x1024xbf16> to vector<4x816xbf16>
    %cst_19 = arith.constant dense<0.000000e+00> : vector<8x816xf32>
    %29 = tpu.matmul %27, %28, %cst_19 {dimension_numbers = #tpu.dot_dimension_numbers<[1], [0], [0], [1], [0, 0, 1, 1], [], []>} : vector<8x4xbf16>, vector<4x816xbf16>, vector<8x816xf32> -> vector<8x816xf32>
    %30 = arith.addf %25, %29 : vector<8x816xf32>
    %c6 = arith.constant 6 : index
    %c0_20 = arith.constant 0 : index
    %c0_21 = arith.constant 0 : index
    %31 = vector.load %arg2[%c6, %c0_20, %c0_21] : memref<9x8x4xbf16, #tpu.memory_space<vmem>>, vector<1x8x4xbf16>
    %32 = vector.shape_cast %31 : vector<1x8x4xbf16> to vector<8x4xbf16>
    %33 = vector.extract_strided_slice %1 {offsets = [0, 121], sizes = [4, 816], strides = [1, 1]} : vector<4x1024xbf16> to vector<4x816xbf16>
    %cst_22 = arith.constant dense<0.000000e+00> : vector<8x816xf32>
    %34 = tpu.matmul %32, %33, %cst_22 {dimension_numbers = #tpu.dot_dimension_numbers<[1], [0], [0], [1], [0, 0, 1, 1], [], []>} : vector<8x4xbf16>, vector<4x816xbf16>, vector<8x816xf32> -> vector<8x816xf32>
    %35 = arith.addf %30, %34 : vector<8x816xf32>
    %c7 = arith.constant 7 : index
    %c0_23 = arith.constant 0 : index
    %c0_24 = arith.constant 0 : index
    %36 = vector.load %arg2[%c7, %c0_23, %c0_24] : memref<9x8x4xbf16, #tpu.memory_space<vmem>>, vector<1x8x4xbf16>
    %37 = vector.shape_cast %36 : vector<1x8x4xbf16> to vector<8x4xbf16>
    %38 = vector.extract_strided_slice %1 {offsets = [0, 122], sizes = [4, 816], strides = [1, 1]} : vector<4x1024xbf16> to vector<4x816xbf16>
    %cst_25 = arith.constant dense<0.000000e+00> : vector<8x816xf32>
    %39 = tpu.matmul %37, %38, %cst_25 {dimension_numbers = #tpu.dot_dimension_numbers<[1], [0], [0], [1], [0, 0, 1, 1], [], []>} : vector<8x4xbf16>, vector<4x816xbf16>, vector<8x816xf32> -> vector<8x816xf32>
    %40 = arith.addf %35, %39 : vector<8x816xf32>
    %c8 = arith.constant 8 : index
    %c0_26 = arith.constant 0 : index
    %c0_27 = arith.constant 0 : index
    %41 = vector.load %arg2[%c8, %c0_26, %c0_27] : memref<9x8x4xbf16, #tpu.memory_space<vmem>>, vector<1x8x4xbf16>
    %42 = vector.shape_cast %41 : vector<1x8x4xbf16> to vector<8x4xbf16>
    %43 = vector.extract_strided_slice %1 {offsets = [0, 123], sizes = [4, 816], strides = [1, 1]} : vector<4x1024xbf16> to vector<4x816xbf16>
    %cst_28 = arith.constant dense<0.000000e+00> : vector<8x816xf32>
    %44 = tpu.matmul %42, %43, %cst_28 {dimension_numbers = #tpu.dot_dimension_numbers<[1], [0], [0], [1], [0, 0, 1, 1], [], []>} : vector<8x4xbf16>, vector<4x816xbf16>, vector<8x816xf32> -> vector<8x816xf32>
    %45 = arith.addf %40, %44 : vector<8x816xf32>
    %c0_29 = arith.constant 0 : index
    %c0_30 = arith.constant 0 : index
    %46 = vector.load %arg3[%c0_29, %c0_30] : memref<8x1xf32, #tpu.memory_space<vmem>>, vector<8x1xf32>
    %47 = vector.broadcast %46 : vector<8x1xf32> to vector<8x816xf32>
    %48 = arith.addf %45, %47 : vector<8x816xf32>
    %cst_31 = arith.constant 0.000000e+00 : f32
    %49 = vector.broadcast %cst_31 : f32 to vector<8x816xf32>
    %50 = arith.maximumf %48, %49 : vector<8x816xf32>
    %c0_32 = arith.constant 0 : index
    %c0_33 = arith.constant 0 : index
    %51 = vector.load %arg4[%c0_32, %c0_33] : memref<1x816xf32, #tpu.memory_space<vmem>>, vector<1x816xf32>
    %52 = vector.broadcast %51 : vector<1x816xf32> to vector<8x816xf32>
    %53 = arith.mulf %50, %52 : vector<8x816xf32>
    %54 = arith.truncf %53 : vector<8x816xf32> to vector<8x816xbf16>
    %c0_34 = arith.constant 0 : index
    %c0_35 = arith.constant 0 : index
    %c0_36 = arith.constant 0 : index
    %55 = vector.load %arg5[%c0_34, %c0_35, %c0_36] : memref<9x4x8xbf16, #tpu.memory_space<vmem>>, vector<1x4x8xbf16>
    %56 = vector.shape_cast %55 : vector<1x4x8xbf16> to vector<4x8xbf16>
    %57 = vector.extract_strided_slice %54 {offsets = [0, 5], sizes = [8, 768], strides = [1, 1]} : vector<8x816xbf16> to vector<8x768xbf16>
    %cst_37 = arith.constant dense<0.000000e+00> : vector<4x768xf32>
    %58 = tpu.matmul %56, %57, %cst_37 {dimension_numbers = #tpu.dot_dimension_numbers<[1], [0], [0], [1], [0, 0, 1, 1], [], []>} : vector<4x8xbf16>, vector<8x768xbf16>, vector<4x768xf32> -> vector<4x768xf32>
    %c1_38 = arith.constant 1 : index
    %c0_39 = arith.constant 0 : index
    %c0_40 = arith.constant 0 : index
    %59 = vector.load %arg5[%c1_38, %c0_39, %c0_40] : memref<9x4x8xbf16, #tpu.memory_space<vmem>>, vector<1x4x8xbf16>
    %60 = vector.shape_cast %59 : vector<1x4x8xbf16> to vector<4x8xbf16>
    %61 = vector.extract_strided_slice %54 {offsets = [0, 6], sizes = [8, 768], strides = [1, 1]} : vector<8x816xbf16> to vector<8x768xbf16>
    %cst_41 = arith.constant dense<0.000000e+00> : vector<4x768xf32>
    %62 = tpu.matmul %60, %61, %cst_41 {dimension_numbers = #tpu.dot_dimension_numbers<[1], [0], [0], [1], [0, 0, 1, 1], [], []>} : vector<4x8xbf16>, vector<8x768xbf16>, vector<4x768xf32> -> vector<4x768xf32>
    %63 = arith.addf %58, %62 : vector<4x768xf32>
    %c2_42 = arith.constant 2 : index
    %c0_43 = arith.constant 0 : index
    %c0_44 = arith.constant 0 : index
    %64 = vector.load %arg5[%c2_42, %c0_43, %c0_44] : memref<9x4x8xbf16, #tpu.memory_space<vmem>>, vector<1x4x8xbf16>
    %65 = vector.shape_cast %64 : vector<1x4x8xbf16> to vector<4x8xbf16>
    %66 = vector.extract_strided_slice %54 {offsets = [0, 7], sizes = [8, 768], strides = [1, 1]} : vector<8x816xbf16> to vector<8x768xbf16>
    %cst_45 = arith.constant dense<0.000000e+00> : vector<4x768xf32>
    %67 = tpu.matmul %65, %66, %cst_45 {dimension_numbers = #tpu.dot_dimension_numbers<[1], [0], [0], [1], [0, 0, 1, 1], [], []>} : vector<4x8xbf16>, vector<8x768xbf16>, vector<4x768xf32> -> vector<4x768xf32>
    %68 = arith.addf %63, %67 : vector<4x768xf32>
    %c3_46 = arith.constant 3 : index
    %c0_47 = arith.constant 0 : index
    %c0_48 = arith.constant 0 : index
    %69 = vector.load %arg5[%c3_46, %c0_47, %c0_48] : memref<9x4x8xbf16, #tpu.memory_space<vmem>>, vector<1x4x8xbf16>
    %70 = vector.shape_cast %69 : vector<1x4x8xbf16> to vector<4x8xbf16>
    %71 = vector.extract_strided_slice %54 {offsets = [0, 23], sizes = [8, 768], strides = [1, 1]} : vector<8x816xbf16> to vector<8x768xbf16>
    %cst_49 = arith.constant dense<0.000000e+00> : vector<4x768xf32>
    %72 = tpu.matmul %70, %71, %cst_49 {dimension_numbers = #tpu.dot_dimension_numbers<[1], [0], [0], [1], [0, 0, 1, 1], [], []>} : vector<4x8xbf16>, vector<8x768xbf16>, vector<4x768xf32> -> vector<4x768xf32>
    %73 = arith.addf %68, %72 : vector<4x768xf32>
    %c4_50 = arith.constant 4 : index
    %c0_51 = arith.constant 0 : index
    %c0_52 = arith.constant 0 : index
    %74 = vector.load %arg5[%c4_50, %c0_51, %c0_52] : memref<9x4x8xbf16, #tpu.memory_space<vmem>>, vector<1x4x8xbf16>
    %75 = vector.shape_cast %74 : vector<1x4x8xbf16> to vector<4x8xbf16>
    %76 = vector.extract_strided_slice %54 {offsets = [0, 24], sizes = [8, 768], strides = [1, 1]} : vector<8x816xbf16> to vector<8x768xbf16>
    %cst_53 = arith.constant dense<0.000000e+00> : vector<4x768xf32>
    %77 = tpu.matmul %75, %76, %cst_53 {dimension_numbers = #tpu.dot_dimension_numbers<[1], [0], [0], [1], [0, 0, 1, 1], [], []>} : vector<4x8xbf16>, vector<8x768xbf16>, vector<4x768xf32> -> vector<4x768xf32>
    %78 = arith.addf %73, %77 : vector<4x768xf32>
    %c5_54 = arith.constant 5 : index
    %c0_55 = arith.constant 0 : index
    %c0_56 = arith.constant 0 : index
    %79 = vector.load %arg5[%c5_54, %c0_55, %c0_56] : memref<9x4x8xbf16, #tpu.memory_space<vmem>>, vector<1x4x8xbf16>
    %80 = vector.shape_cast %79 : vector<1x4x8xbf16> to vector<4x8xbf16>
    %81 = vector.extract_strided_slice %54 {offsets = [0, 25], sizes = [8, 768], strides = [1, 1]} : vector<8x816xbf16> to vector<8x768xbf16>
    %cst_57 = arith.constant dense<0.000000e+00> : vector<4x768xf32>
    %82 = tpu.matmul %80, %81, %cst_57 {dimension_numbers = #tpu.dot_dimension_numbers<[1], [0], [0], [1], [0, 0, 1, 1], [], []>} : vector<4x8xbf16>, vector<8x768xbf16>, vector<4x768xf32> -> vector<4x768xf32>
    %83 = arith.addf %78, %82 : vector<4x768xf32>
    %c6_58 = arith.constant 6 : index
    %c0_59 = arith.constant 0 : index
    %c0_60 = arith.constant 0 : index
    %84 = vector.load %arg5[%c6_58, %c0_59, %c0_60] : memref<9x4x8xbf16, #tpu.memory_space<vmem>>, vector<1x4x8xbf16>
    %85 = vector.shape_cast %84 : vector<1x4x8xbf16> to vector<4x8xbf16>
    %86 = vector.extract_strided_slice %54 {offsets = [0, 41], sizes = [8, 768], strides = [1, 1]} : vector<8x816xbf16> to vector<8x768xbf16>
    %cst_61 = arith.constant dense<0.000000e+00> : vector<4x768xf32>
    %87 = tpu.matmul %85, %86, %cst_61 {dimension_numbers = #tpu.dot_dimension_numbers<[1], [0], [0], [1], [0, 0, 1, 1], [], []>} : vector<4x8xbf16>, vector<8x768xbf16>, vector<4x768xf32> -> vector<4x768xf32>
    %88 = arith.addf %83, %87 : vector<4x768xf32>
    %c7_62 = arith.constant 7 : index
    %c0_63 = arith.constant 0 : index
    %c0_64 = arith.constant 0 : index
    %89 = vector.load %arg5[%c7_62, %c0_63, %c0_64] : memref<9x4x8xbf16, #tpu.memory_space<vmem>>, vector<1x4x8xbf16>
    %90 = vector.shape_cast %89 : vector<1x4x8xbf16> to vector<4x8xbf16>
    %91 = vector.extract_strided_slice %54 {offsets = [0, 42], sizes = [8, 768], strides = [1, 1]} : vector<8x816xbf16> to vector<8x768xbf16>
    %cst_65 = arith.constant dense<0.000000e+00> : vector<4x768xf32>
    %92 = tpu.matmul %90, %91, %cst_65 {dimension_numbers = #tpu.dot_dimension_numbers<[1], [0], [0], [1], [0, 0, 1, 1], [], []>} : vector<4x8xbf16>, vector<8x768xbf16>, vector<4x768xf32> -> vector<4x768xf32>
    %93 = arith.addf %88, %92 : vector<4x768xf32>
    %c8_66 = arith.constant 8 : index
    %c0_67 = arith.constant 0 : index
    %c0_68 = arith.constant 0 : index
    %94 = vector.load %arg5[%c8_66, %c0_67, %c0_68] : memref<9x4x8xbf16, #tpu.memory_space<vmem>>, vector<1x4x8xbf16>
    %95 = vector.shape_cast %94 : vector<1x4x8xbf16> to vector<4x8xbf16>
    %96 = vector.extract_strided_slice %54 {offsets = [0, 43], sizes = [8, 768], strides = [1, 1]} : vector<8x816xbf16> to vector<8x768xbf16>
    %cst_69 = arith.constant dense<0.000000e+00> : vector<4x768xf32>
    %97 = tpu.matmul %95, %96, %cst_69 {dimension_numbers = #tpu.dot_dimension_numbers<[1], [0], [0], [1], [0, 0, 1, 1], [], []>} : vector<4x8xbf16>, vector<8x768xbf16>, vector<4x768xf32> -> vector<4x768xf32>
    %98 = arith.addf %93, %97 : vector<4x768xf32>
    %c0_70 = arith.constant 0 : index
    %c0_71 = arith.constant 0 : index
    %99 = vector.load %arg6[%c0_70, %c0_71] : memref<4x1xf32, #tpu.memory_space<vmem>>, vector<4x1xf32>
    %100 = vector.broadcast %99 : vector<4x1xf32> to vector<4x768xf32>
    %101 = arith.addf %98, %100 : vector<4x768xf32>
    %cst_72 = arith.constant 0.000000e+00 : f32
    %102 = vector.broadcast %cst_72 : f32 to vector<4x768xf32>
    %103 = arith.subf %102, %101 : vector<4x768xf32>
    %104 = math.exp %103 : vector<4x768xf32>
    %cst_73 = arith.constant 1.000000e+00 : f32
    %105 = vector.broadcast %cst_73 : f32 to vector<4x768xf32>
    %106 = arith.addf %105, %104 : vector<4x768xf32>
    %107 = tpu.reciprocal %106 {approx = true} : vector<4x768xf32> -> vector<4x768xf32>
    %c0_74 = arith.constant 0 : index
    %c0_75 = arith.constant 0 : index
    %c0_76 = arith.constant 0 : index
    %108 = vector.load %arg7[%c0_74, %c0_75, %c0_76] : memref<1x4x768xf32, #tpu.memory_space<vmem>>, vector<1x4x768xf32>
    %109 = vector.shape_cast %108 : vector<1x4x768xf32> to vector<4x768xf32>
    %110 = vector.shape_cast %107 : vector<4x768xf32> to vector<1x4x768xf32>
    tpu.vector_store %arg7[%c0_74, %c0_75, %c0_76], %110 {strides = array<i32>} : memref<1x4x768xf32, #tpu.memory_space<vmem>>, vector<1x4x768xf32>,
    return
  }
  func.func @transform_0(%arg0: i32) -> (i32, i32, i32) {
    %c0_i32 = arith.constant 0 : i32
    %c0_i32_0 = arith.constant 0 : i32
    %c0_i32_1 = arith.constant 0 : i32
    return %arg0, %c0_i32, %c0_i32_0 : i32, i32, i32
  }
  func.func @transform_1(%arg0: i32) -> (i32, i32, i32) {
    %c0_i32 = arith.constant 0 : i32
    %c0_i32_0 = arith.constant 0 : i32
    %c0_i32_1 = arith.constant 0 : i32
    %c0_i32_2 = arith.constant 0 : i32
    return %c0_i32, %c0_i32_0, %c0_i32_1 : i32, i32, i32
  }
  func.func @transform_2(%arg0: i32) -> (i32, i32) {
    %c0_i32 = arith.constant 0 : i32
    %c0_i32_0 = arith.constant 0 : i32
    %c0_i32_1 = arith.constant 0 : i32
    return %c0_i32, %c0_i32_0 : i32, i32
  }
  func.func @transform_3(%arg0: i32) -> (i32, i32) {
    %c0_i32 = arith.constant 0 : i32
    %c0_i32_0 = arith.constant 0 : i32
    %c0_i32_1 = arith.constant 0 : i32
    return %c0_i32, %c0_i32_0 : i32, i32
  }
  func.func @transform_4(%arg0: i32) -> (i32, i32, i32) {
    %c0_i32 = arith.constant 0 : i32
    %c0_i32_0 = arith.constant 0 : i32
    %c0_i32_1 = arith.constant 0 : i32
    %c0_i32_2 = arith.constant 0 : i32
    return %c0_i32, %c0_i32_0, %c0_i32_1 : i32, i32, i32
  }
  func.func @transform_5(%arg0: i32) -> (i32, i32) {
    %c0_i32 = arith.constant 0 : i32
    %c0_i32_0 = arith.constant 0 : i32
    %c0_i32_1 = arith.constant 0 : i32
    return %c0_i32, %c0_i32_0 : i32, i32
  }
  func.func @transform_6(%arg0: i32) -> (i32, i32, i32) {
    %c0_i32 = arith.constant 0 : i32
    %c0_i32_0 = arith.constant 0 : i32
    %c0_i32_1 = arith.constant 0 : i32
    return %arg0, %c0_i32, %c0_i32_0 : i32, i32, i32
  }
}

</mosaic_0001>

<bundles_post_ra>
// kernel: _fused_conv_relu_conv_sigmoid.1
= control target key start
LH: loop header
LB: loop body
LE: loop exit
PB: predicated region body
PF: predicated region fallthrough
CT: control target
= control target key end

     0   :  { %v35_v0 = vlaneseq  ;;  %v3969_v2 = vmov 1983009808   ;;  %v3970_v8 = vmov 0   ;;  %s3971_s25 = smov 42   ;;  %s3973_s26 = smov 41   ;;  %vm81_vm0 = vcmask 343040   ;;  %s4706_s0 = inlined_call_operand.vmem [shape: bf16[1,4,1024], index: 0, kind: input, shape index: {}]   ;;  %s4707_s1 = inlined_call_operand.vmem [shape: bf16[9,8,4], index: 1, kind: input, shape index: {}]   ;;  %s4708_s2 = inlined_call_operand.vmem [shape: f32[8,1], index: 2, kind: input, shape index: {}]   ;;  %s4709_s3 = inlined_call_operand.vmem [shape: f32[1,816], index: 3, kind: input, shape index: {}]   ;;  %s4710_s5 = inlined_call_operand.vmem [shape: f32[4,1], index: 5, kind: input, shape index: {}]   ;;  %s4711_s4 = inlined_call_operand.vmem [shape: bf16[9,4,8], index: 4, kind: input, shape index: {}]   ;;  %s4712_s6 = inlined_call_operand.vmem [shape: f32[1,4,768], index: 6, kind: output, shape index: {}]  }
   0x1   :  { %v24_v1 = vld [vmem:[%s4706_s0] sm:$0xff]  ;;  %v33_v3 = vunpack.c.l.s4 %v3969_v2  ;;  %147 = vmatprep.mubr.bf16.mxu0 %v3970_v8  ;;  %188 = vmatprep.mubr.bf16.mxu1 %v3970_v8  ;;  %v25_v9 = vld [vmem:[%s4706_s0 + $0x8] sm:$0xff]  ;;  %s3972_s0 = smov 43   ;;  %s3974_s27 = smov 25   ;;  %vm93_vm1 = vcmask 1041408   ;;  %vm89_vm2 = vcmask 31744  }
   0x2   :  { %v4029_v4 = vshrl.u32 %v35_v0, 7  ;;  %v31_v6 = vcombine.high %v24_v1, %v24_v1  ;;  %3941 = vset.pattern.permute.xlu0 %v3970_v8  ;;  %3942 = vset.pattern.permute.xlu1 %v3970_v8  ;;  %v48_v12 = vcombine.high %v25_v9, %v25_v9  ;;  %s3975_s28 = smov 24   ;;  %s3976_s29 = smov 23   ;;  %v3714_v26 = vld [vmem:[%s4707_s1 + $0x4] sm:$0xf]  ;;  %v3979_v37 = vmov 0.0  }
   0x3   :  { %v34_v5 = vunpack.c.0.s8 %v33_v3  ;;  %s3977_s30 = smov 7   ;;  %s3978_s7 = smov 6   ;;  %vm294_vm3 = vcmask 351232   ;;  %vm3981_vm4 = vmmov 0   ;;  %v26_v50 = vld [vmem:[%s4707_s1] sm:$0xf] }
   0x4   :  { %s3980_s10 = smov 5   ;;  %vm507_vm5 = vcmask 334848   ;;  %vm727_vm6 = vcmask 203776   ;;  %vm947_vm7 = vcmask 195584   ;;  %vm1167_vm8 = vcmask 187392   ;;  %s3987_s8 = smov 103  }
   0x5   :  { %v37_v7 = vsub.s32 %v34_v5, %v4029_v4  ;;  %vm1387_vm9 = vcmask 56320   ;;  %vm1607_vm10 = vcmask 48128   ;;  %vm1827_vm11 = vcmask 39936   ;;  %s3988_s9 = smov 87   ;;  %s3990_s11 = smov 85  }
   0x6   :  { %vm2124_vm12 = vcmask 998400   ;;  %vm2135_vm13 = vcmask 1043456   ;;  %vm2131_vm14 = vcmask 64512   ;;  %vm2291_vm15 = vcmask 1006592  }
   0x7   :  { %v4039_v10 = vrot.slane %v24_v1, %v37_v7  ;;  %v4041_v11 = vrot.slane %v31_v6, %v37_v7  ;;  %v4053_v15 = vrot.slane %v25_v9, %v37_v7  ;;  %v4061_v17 = vrot.slane %v48_v12, %v37_v7  ;;  %v3729_v7 = vld [vmem:[%s4707_s1 + $0x8] sm:$0xf] }
   0x9   :  { %65 = vrot.lane.b32.xlu0 %v4039_v10, %s3971_s25  ;;  %69 = vrot.lane.b32.xlu1 %v4041_v11, %s3971_s25  ;;  %v4047_v13 = vcombine.high %v4039_v10, %v4039_v10  ;;  %v4051_v14 = vcombine.high %v4041_v11, %v4041_v11  ;;  %v4059_v16 = vcombine.high %v4053_v15, %v4053_v15 }
   0xa   :  { %v4067_v18 = vcombine.high %v4061_v17, %v4061_v17 }
   0xd   :  { %67 = vrot.lane.b32.xlu0 %v4047_v13, %s3971_s25  ;;  %71 = vrot.lane.b32.xlu1 %v4051_v14, %s3971_s25 }
  0x11   :  { %73 = vrot.lane.b32.xlu0 %v4053_v15, %s3971_s25  ;;  %75 = vrot.lane.b32.xlu1 %v4059_v16, %s3971_s25 }
  0x15   :  { %77 = vrot.lane.b32.xlu0 %v4061_v17, %s3971_s25  ;;  %79 = vrot.lane.b32.xlu1 %v4067_v18, %s3971_s25 }
  0x19   :  { %278 = vrot.lane.b32.xlu0 %v4039_v10, %s3972_s0  ;;  %280 = vrot.lane.b32.xlu1 %v4047_v13, %s3972_s0 }
  0x1d   :  { %282 = vrot.lane.b32.xlu0 %v4041_v11, %s3972_s0  ;;  %284 = vrot.lane.b32.xlu1 %v4051_v14, %s3972_s0 }
  0x21   :  { %286 = vrot.lane.b32.xlu0 %v4053_v15, %s3972_s0  ;;  %288 = vrot.lane.b32.xlu1 %v4059_v16, %s3972_s0 }
  0x25   :  { %290 = vrot.lane.b32.xlu0 %v4061_v17, %s3972_s0  ;;  %292 = vrot.lane.b32.xlu1 %v4067_v18, %s3972_s0 }
  0x29   :  { %491 = vrot.lane.b32.xlu0 %v4039_v10, %s3973_s26  ;;  %493 = vrot.lane.b32.xlu1 %v4047_v13, %s3973_s26 }
  0x2d   :  { %495 = vrot.lane.b32.xlu0 %v4041_v11, %s3973_s26  ;;  %497 = vrot.lane.b32.xlu1 %v4051_v14, %s3973_s26 }
  0x31   :  { %499 = vrot.lane.b32.xlu0 %v4053_v15, %s3973_s26  ;;  %501 = vrot.lane.b32.xlu1 %v4059_v16, %s3973_s26 }
  0x35   :  { %503 = vrot.lane.b32.xlu0 %v4061_v17, %s3973_s26  ;;  %505 = vrot.lane.b32.xlu1 %v4067_v18, %s3973_s26 }
  0x39   :  { %711 = vrot.lane.b32.xlu0 %v4039_v10, %s3974_s27  ;;  %713 = vrot.lane.b32.xlu1 %v4047_v13, %s3974_s27 }
  0x3d   :  { %715 = vrot.lane.b32.xlu0 %v4041_v11, %s3974_s27  ;;  %717 = vrot.lane.b32.xlu1 %v4051_v14, %s3974_s27 }
  0x41   :  { %719 = vrot.lane.b32.xlu0 %v4053_v15, %s3974_s27  ;;  %721 = vrot.lane.b32.xlu1 %v4059_v16, %s3974_s27 }
  0x45   :  { %723 = vrot.lane.b32.xlu0 %v4061_v17, %s3974_s27  ;;  %725 = vrot.lane.b32.xlu1 %v4067_v18, %s3974_s27 }
  0x49   :  { %931 = vrot.lane.b32.xlu0 %v4039_v10, %s3975_s28  ;;  %933 = vrot.lane.b32.xlu1 %v4047_v13, %s3975_s28 }
  0x4d   :  { %935 = vrot.lane.b32.xlu0 %v4041_v11, %s3975_s28  ;;  %937 = vrot.lane.b32.xlu1 %v4051_v14, %s3975_s28 }
  0x51   :  { %939 = vrot.lane.b32.xlu0 %v4053_v15, %s3975_s28  ;;  %941 = vrot.lane.b32.xlu1 %v4059_v16, %s3975_s28 }
  0x55   :  { %943 = vrot.lane.b32.xlu0 %v4061_v17, %s3975_s28  ;;  %945 = vrot.lane.b32.xlu1 %v4067_v18, %s3975_s28  ;;  %s3983_s28 = smov 123  }
  0x59   :  { %1151 = vrot.lane.b32.xlu0 %v4039_v10, %s3976_s29  ;;  %1153 = vrot.lane.b32.xlu1 %v4047_v13, %s3976_s29 }
  0x5d   :  { %1155 = vrot.lane.b32.xlu0 %v4041_v11, %s3976_s29  ;;  %1157 = vrot.lane.b32.xlu1 %v4051_v14, %s3976_s29 }
  0x61   :  { %1159 = vrot.lane.b32.xlu0 %v4053_v15, %s3976_s29  ;;  %1161 = vrot.lane.b32.xlu1 %v4059_v16, %s3976_s29 }
  0x65   :  { %1163 = vrot.lane.b32.xlu0 %v4061_v17, %s3976_s29  ;;  %1165 = vrot.lane.b32.xlu1 %v4067_v18, %s3976_s29  ;;  %s3984_s29 = smov 121  }
  0x69   :  { %1371 = vrot.lane.b32.xlu0 %v4039_v10, %s3977_s30  ;;  %1373 = vrot.lane.b32.xlu1 %v4047_v13, %s3977_s30 }
  0x6d   :  { %1375 = vrot.lane.b32.xlu0 %v4041_v11, %s3977_s30  ;;  %1377 = vrot.lane.b32.xlu1 %v4051_v14, %s3977_s30 }
  0x71   :  { %1379 = vrot.lane.b32.xlu0 %v4053_v15, %s3977_s30  ;;  %1381 = vrot.lane.b32.xlu1 %v4059_v16, %s3977_s30 }
  0x75   :  { %1383 = vrot.lane.b32.xlu0 %v4061_v17, %s3977_s30  ;;  %1385 = vrot.lane.b32.xlu1 %v4067_v18, %s3977_s30  ;;  %s3985_s30 = smov 105  }
  0x79   :  { %1591 = vrot.lane.b32.xlu0 %v4039_v10, %s3978_s7  ;;  %1593 = vrot.lane.b32.xlu1 %v4047_v13, %s3978_s7 }
  0x7b   :  { %v66_v19 = vpop.permute.xlu0 %65  ;;  %v70_v20 = vpop.permute.xlu1 %69 }
  0x7d   :  { %1595 = vrot.lane.b32.xlu0 %v4041_v11, %s3978_s7  ;;  %1597 = vrot.lane.b32.xlu1 %v4051_v14, %s3978_s7 }
  0x7f   :  { %v68_v21 = vpop.permute.xlu0 %67  ;;  %v72_v22 = vpop.permute.xlu1 %71 }
  0x80   :  { %v83_v23 = vsel %vm81_vm0, %v68_v21, %v70_v20  ;;  %v82_v24 = vsel %vm81_vm0, %v66_v19, %v68_v21  ;;  %v84_v29 = vsel %vm81_vm0, %v70_v20, %v72_v22 }
  0x81   :  { %1599 = vrot.lane.b32.xlu0 %v4053_v15, %s3978_s7  ;;  %3715 = vmatprep.subr.msk.bf16.mxu0 %vm93_vm1, %v83_v23  ;;  %v95_v25 = vsel %vm93_vm1, %v82_v24, 0  ;;  %v101_v31 = vsel %vm93_vm1, %v84_v29, 0 }
  0x82   :  { %1601 = vrot.lane.b32.xlu1 %v4059_v16, %s3978_s7  ;;  %116 = vmatpush1.bf16.msra.mxu0 %v95_v25 }
  0x83   :  { %v74_v27 = vpop.permute.xlu0 %73  ;;  %v76_v28 = vpop.permute.xlu1 %75 }
  0x84   :  { %v85_v30 = vsel %vm81_vm0, %v72_v22, %v74_v27  ;;  %v86_v32 = vsel %vm81_vm0, %v74_v27, %v76_v28 }
  0x85   :  { %1603 = vrot.lane.b32.xlu0 %v4061_v17, %s3978_s7  ;;  %3716 = vmatmul.mubr.msk.bf16.vlgmr.msra.gmra.mrb[0].mxu0 %vm89_vm2, %v3714_v26  ;;  %v107_v39 = vsel %vm93_vm1, %v86_v32, 0 }
  0x86   :  { %1605 = vrot.lane.b32.xlu1 %v4067_v18, %s3978_s7  ;;  %3717 = vmatprep.subr.msk.bf16.mxu1 %vm93_vm1, %v85_v30  ;;  %s3986_s7 = smov 104  }
  0x87   :  { %157 = vmatpush1.bf16.msra.mxu1 %v101_v31  ;;  %v78_v33 = vpop.permute.xlu0 %77  ;;  %v80_v34 = vpop.permute.xlu1 %79  ;;  %229 = vmatprep.mubr.bf16.mxu0 %v3970_v8 }
  0x88   :  { %v88_v35 = vsel %vm81_vm0, %v78_v33, %v80_v34  ;;  %v87_v36 = vsel %vm81_vm0, %v76_v28, %v78_v33  ;;  %3865 = vmatprep.subr.bf16.mxu1 %v3979_v37  ;;  %v3737_v28 = vld [vmem:[%s4707_s1 + $0xc] sm:$0xf]  ;;  %vm2458_vm0 = vcmask 990208  }
  0x89   :  { %v113_v38 = vsel %vm93_vm1, %v88_v35, 0  ;;  %1811 = vrot.lane.b32.xlu0 %v4039_v10, %s3980_s10  ;;  %3719 = vmatprep.subr.msk.bf16.mxu0 %vm93_vm1, %v87_v36 }
  0x8a   :  { %1813 = vrot.lane.b32.xlu1 %v4047_v13, %s3980_s10  ;;  %3718 = vmatmul.mubr.msk.bf16.vlgmr.msra.gmra.mrb[0].mxu1 %vm89_vm2, %v3714_v26 }
  0x8b   :  { %198 = vmatpush1.bf16.msra.mxu0 %v107_v39  ;;  %3866 = vmatpush3.bf16.msra.mxu1 %v113_v38  ;;  %v279_v40 = vpop.permute.xlu0 %278  ;;  %v281_v41 = vpop.permute.xlu1 %280 }
  0x8c   :  { %3867 = vmatprep.mubr.msk.bf16.mxu1 %vm3981_vm4, %v3979_v37  ;;  %v295_v42 = vsel %vm294_vm3, %v279_v40, %v281_v41 }
  0x8d   :  { %1815 = vrot.lane.b32.xlu0 %v4041_v11, %s3980_s10  ;;  %v306_v47 = vsel %vm93_vm1, %v295_v42, 0 }
  0x8e   :  { %1817 = vrot.lane.b32.xlu1 %v4051_v14, %s3980_s10  ;;  %3720 = vmatmul.mubr.msk.bf16.vlgmr.msra.gmra.mrb[4].mxu0 %vm89_vm2, %v3714_v26 }
  0x8f   :  { %v283_v43 = vpop.permute.xlu0 %282  ;;  %v285_v44 = vpop.permute.xlu1 %284  ;;  %358 = vmatprep.mubr.bf16.mxu0 %v3970_v8 }
  0x90   :  { %v296_v45 = vsel %vm294_vm3, %v281_v41, %v283_v43  ;;  %v297_v46 = vsel %vm294_vm3, %v283_v43, %v285_v44 }
  0x91   :  { %1819 = vrot.lane.b32.xlu0 %v4053_v15, %s3980_s10  ;;  %3722 = vmatprep.subr.msk.bf16.mxu0 %vm93_vm1, %v296_v45  ;;  %v312_v52 = vsel %vm93_vm1, %v297_v46, 0 }
  0x92   :  { %1821 = vrot.lane.b32.xlu1 %v4059_v16, %s3980_s10  ;;  %3868 = vmatmul.mubr.msk.bf16.vlgmr.msra.gmra.mrb[4].mxu1 %vm89_vm2, %v3714_v26 }
  0x93   :  { %327 = vmatpush1.bf16.msra.mxu0 %v306_v47  ;;  %v287_v48 = vpop.permute.xlu0 %286  ;;  %v289_v49 = vpop.permute.xlu1 %288  ;;  %399 = vmatprep.mubr.bf16.mxu1 %v3970_v8 }
  0x94   :  { %v298_v51 = vsel %vm294_vm3, %v285_v44, %v287_v48  ;;  %v299_v53 = vsel %vm294_vm3, %v287_v48, %v289_v49 }
  0x95   :  { %1823 = vrot.lane.b32.xlu0 %v4061_v17, %s3980_s10  ;;  %3724 = vmatprep.subr.msk.bf16.mxu1 %vm93_vm1, %v298_v51  ;;  %v318_v59 = vsel %vm93_vm1, %v299_v53, 0 }
  0x96   :  { %3723 = vmatmul.mubr.msk.bf16.vlgmr.msra.gmra.mrb[8].mxu0 %vm89_vm2, %v26_v50  ;;  %368 = vmatpush1.bf16.msra.mxu1 %v312_v52 }
  0x97   :  { %v291_v54 = vpop.permute.xlu0 %290  ;;  %v293_v55 = vpop.permute.xlu1 %292  ;;  %1825 = vrot.lane.b32.xlu1 %v4067_v18, %s3980_s10  ;;  %3871 = vmatprep.subr.bf16.mxu1 %v3979_v37  ;;  %s3989_s10 = smov 86  }
  0x98   :  { %v301_v56 = vsel %vm294_vm3, %v291_v54, %v293_v55  ;;  %v300_v57 = vsel %vm294_vm3, %v289_v49, %v291_v54  ;;  %440 = vmatprep.mubr.bf16.mxu0 %v3970_v8  ;;  %v3745_v49 = vld [vmem:[%s4707_s1 + $0x10] sm:$0xf]  ;;  %vm2977_vm3 = vcmask 842752  }
  0x99   :  { %v324_v58 = vsel %vm93_vm1, %v301_v56, 0  ;;  %3726 = vmatprep.subr.msk.bf16.mxu0 %vm93_vm1, %v300_v57 }
  0x9a   :  { %3725 = vmatmul.mubr.msk.bf16.vlgmr.msra.gmra.mrb[8].mxu1 %vm89_vm2, %v26_v50  ;;  %409 = vmatpush1.bf16.msra.mxu0 %v318_v59 }
  0x9b   :  { %3872 = vmatpush3.bf16.msra.mxu1 %v324_v58  ;;  %v492_v60 = vpop.permute.xlu0 %491  ;;  %v494_v61 = vpop.permute.xlu1 %493  ;;  %3873 = vmatprep.mubr.msk.bf16.mxu1 %vm3981_vm4, %v3979_v37 }
  0x9c   :  { %v508_v62 = vsel %vm507_vm5, %v492_v60, %v494_v61 }
  0x9d   :  { %v519_v2 = vsel %vm93_vm1, %v508_v62, 0 }
  0x9e   :  { %3727 = vmatmul.mubr.msk.bf16.vlgmr.msra.gmra.mrb[12].mxu0 %vm89_vm2, %v26_v50 }
  0x9f   :  { %v496_v63 = vpop.permute.xlu0 %495  ;;  %v498_v0 = vpop.permute.xlu1 %497  ;;  %571 = vmatprep.mubr.bf16.mxu0 %v3970_v8 }
  0xa0   :  { %v509_v1 = vsel %vm507_vm5, %v494_v61, %v496_v63  ;;  %v510_v3 = vsel %vm507_vm5, %v496_v63, %v498_v0 }
  0xa1   :  { %3730 = vmatprep.subr.msk.bf16.mxu0 %vm93_vm1, %v509_v1  ;;  %v525_v10 = vsel %vm93_vm1, %v510_v3, 0 }
  0xa2   :  { %3874 = vmatmul.mubr.msk.bf16.vlgmr.msra.gmra.mrb[12].mxu1 %vm89_vm2, %v26_v50  ;;  %540 = vmatpush1.bf16.msra.mxu0 %v519_v2 }
  0xa3   :  { %v500_v5 = vpop.permute.xlu0 %499  ;;  %v502_v6 = vpop.permute.xlu1 %501  ;;  %612 = vmatprep.mubr.bf16.mxu1 %v3970_v8 }
  0xa4   :  { %v511_v9 = vsel %vm507_vm5, %v498_v0, %v500_v5  ;;  %v512_v11 = vsel %vm507_vm5, %v500_v5, %v502_v6 }
  0xa5   :  { %3732 = vmatprep.subr.msk.bf16.mxu1 %vm93_vm1, %v511_v9  ;;  %v531_v17 = vsel %vm93_vm1, %v512_v11, 0 }
  0xa6   :  { %3731 = vmatmul.mubr.msk.bf16.vlgmr.msra.gmra.mrb[16].mxu0 %vm89_vm2, %v3729_v7  ;;  %581 = vmatpush1.bf16.msra.mxu1 %v525_v10 }
  0xa7   :  { %v504_v12 = vpop.permute.xlu0 %503  ;;  %v506_v13 = vpop.permute.xlu1 %505  ;;  %3877 = vmatprep.subr.bf16.mxu1 %v3979_v37  ;;  %653 = vmatprep.mubr.bf16.mxu0 %v3970_v8 }
  0xa8   :  { %v514_v14 = vsel %vm507_vm5, %v504_v12, %v506_v13  ;;  %v513_v15 = vsel %vm507_vm5, %v502_v6, %v504_v12  ;;  %v3753_v6 = vld [vmem:[%s4707_s1 + $0x14] sm:$0xf]  ;;  %vm3323_vm5 = vcmask 703488  }
  0xa9   :  { %v537_v16 = vsel %vm93_vm1, %v514_v14, 0  ;;  %3734 = vmatprep.subr.msk.bf16.mxu0 %vm93_vm1, %v513_v15 }
  0xaa   :  { %3733 = vmatmul.mubr.msk.bf16.vlgmr.msra.gmra.mrb[16].mxu1 %vm89_vm2, %v3729_v7  ;;  %622 = vmatpush1.bf16.msra.mxu0 %v531_v17 }
  0xab   :  { %3878 = vmatpush3.bf16.msra.mxu1 %v537_v16  ;;  %v712_v18 = vpop.permute.xlu0 %711  ;;  %v714_v19 = vpop.permute.xlu1 %713  ;;  %3879 = vmatprep.mubr.msk.bf16.mxu1 %vm3981_vm4, %v3979_v37 }
  0xac   :  { %v728_v20 = vsel %vm727_vm6, %v712_v18, %v714_v19 }
  0xad   :  { %v739_v24 = vsel %vm93_vm1, %v728_v20, 0 }
  0xae   :  { %3735 = vmatmul.mubr.msk.bf16.vlgmr.msra.gmra.mrb[20].mxu0 %vm89_vm2, %v3729_v7 }
  0xaf   :  { %v716_v21 = vpop.permute.xlu0 %715  ;;  %v718_v22 = vpop.permute.xlu1 %717  ;;  %791 = vmatprep.mubr.bf16.mxu0 %v3970_v8 }
  0xb0   :  { %v729_v23 = vsel %vm727_vm6, %v714_v19, %v716_v21  ;;  %v730_v25 = vsel %vm727_vm6, %v716_v21, %v718_v22  ;;  %v2029_v19 = vld [vmem:[%s4708_s2] sm:$0xff] }
  0xb1   :  { %3738 = vmatprep.subr.msk.bf16.mxu0 %vm93_vm1, %v729_v23  ;;  %v745_v30 = vsel %vm93_vm1, %v730_v25, 0  ;;  %2032 = vperm.xlu0 %3941, %v2029_v19  }
  0xb2   :  { %3880 = vmatmul.mubr.msk.bf16.vlgmr.msra.gmra.mrb[20].mxu1 %vm89_vm2, %v3729_v7  ;;  %760 = vmatpush1.bf16.msra.mxu0 %v739_v24 }
  0xb3   :  { %v720_v26 = vpop.permute.xlu0 %719  ;;  %v722_v27 = vpop.permute.xlu1 %721  ;;  %832 = vmatprep.mubr.bf16.mxu1 %v3970_v8 }
  0xb4   :  { %v731_v29 = vsel %vm727_vm6, %v718_v22, %v720_v26  ;;  %v732_v31 = vsel %vm727_vm6, %v720_v26, %v722_v27 }
  0xb5   :  { %3740 = vmatprep.subr.msk.bf16.mxu1 %vm93_vm1, %v731_v29  ;;  %v751_v38 = vsel %vm93_vm1, %v732_v31, 0 }
  0xb6   :  { %3739 = vmatmul.mubr.msk.bf16.vlgmr.msra.gmra.mrb[24].mxu0 %vm89_vm2, %v3737_v28  ;;  %801 = vmatpush1.bf16.msra.mxu1 %v745_v30 }
  0xb7   :  { %v724_v32 = vpop.permute.xlu0 %723  ;;  %v726_v33 = vpop.permute.xlu1 %725  ;;  %3883 = vmatprep.subr.bf16.mxu1 %v3979_v37  ;;  %873 = vmatprep.mubr.bf16.mxu0 %v3970_v8 }
  0xb8   :  { %v734_v34 = vsel %vm727_vm6, %v724_v32, %v726_v33  ;;  %v733_v35 = vsel %vm727_vm6, %v722_v27, %v724_v32  ;;  %vm3496_vm6 = vcmask 695296  }
  0xb9   :  { %v757_v36 = vsel %vm93_vm1, %v734_v34, 0  ;;  %3742 = vmatprep.subr.msk.bf16.mxu0 %vm93_vm1, %v733_v35 }
  0xba   :  { %3741 = vmatmul.mubr.msk.bf16.vlgmr.msra.gmra.mrb[24].mxu1 %vm89_vm2, %v3737_v28  ;;  %842 = vmatpush1.bf16.msra.mxu0 %v751_v38 }
  0xbb   :  { %3884 = vmatpush3.bf16.msra.mxu1 %v757_v36  ;;  %v932_v39 = vpop.permute.xlu0 %931  ;;  %v934_v40 = vpop.permute.xlu1 %933  ;;  %3885 = vmatprep.mubr.msk.bf16.mxu1 %vm3981_vm4, %v3979_v37 }
  0xbc   :  { %v948_v41 = vsel %vm947_vm7, %v932_v39, %v934_v40 }
  0xbd   :  { %v959_v45 = vsel %vm93_vm1, %v948_v41, 0 }
  0xbe   :  { %3743 = vmatmul.mubr.msk.bf16.vlgmr.msra.gmra.mrb[28].mxu0 %vm89_vm2, %v3737_v28 }
  0xbf   :  { %v936_v42 = vpop.permute.xlu0 %935  ;;  %v938_v43 = vpop.permute.xlu1 %937  ;;  %1011 = vmatprep.mubr.bf16.mxu0 %v3970_v8 }
  0xc0   :  { %v949_v44 = vsel %vm947_vm7, %v934_v40, %v936_v42  ;;  %v950_v46 = vsel %vm947_vm7, %v936_v42, %v938_v43 }
  0xc1   :  { %3746 = vmatprep.subr.msk.bf16.mxu0 %vm93_vm1, %v949_v44  ;;  %v965_v51 = vsel %vm93_vm1, %v950_v46, 0 }
  0xc2   :  { %3886 = vmatmul.mubr.msk.bf16.vlgmr.msra.gmra.mrb[28].mxu1 %vm89_vm2, %v3737_v28  ;;  %980 = vmatpush1.bf16.msra.mxu0 %v959_v45  ;;  %v3761_v28 = vld [vmem:[%s4707_s1 + $0x18] sm:$0xf] }
  0xc3   :  { %v940_v47 = vpop.permute.xlu0 %939  ;;  %v942_v48 = vpop.permute.xlu1 %941  ;;  %1052 = vmatprep.mubr.bf16.mxu1 %v3970_v8 }
  0xc4   :  { %v951_v50 = vsel %vm947_vm7, %v938_v43, %v940_v47  ;;  %v952_v52 = vsel %vm947_vm7, %v940_v47, %v942_v48 }
  0xc5   :  { %3748 = vmatprep.subr.msk.bf16.mxu1 %vm93_vm1, %v951_v50  ;;  %v971_v58 = vsel %vm93_vm1, %v952_v52, 0 }
  0xc6   :  { %3747 = vmatmul.mubr.msk.bf16.vlgmr.msra.gmra.mrb[32].mxu0 %vm89_vm2, %v3745_v49  ;;  %1021 = vmatpush1.bf16.msra.mxu1 %v965_v51 }
  0xc7   :  { %v944_v53 = vpop.permute.xlu0 %943  ;;  %v946_v54 = vpop.permute.xlu1 %945  ;;  %3889 = vmatprep.subr.bf16.mxu1 %v3979_v37  ;;  %1093 = vmatprep.mubr.bf16.mxu0 %v3970_v8 }
  0xc8   :  { %v953_v55 = vsel %vm947_vm7, %v942_v48, %v944_v53  ;;  %v954_v56 = vsel %vm947_vm7, %v944_v53, %v946_v54  ;;  %v3769_v48 = vld [vmem:[%s4707_s1 + $0x1c] sm:$0xf] }
  0xc9   :  { %v977_v57 = vsel %vm93_vm1, %v954_v56, 0  ;;  %3750 = vmatprep.subr.msk.bf16.mxu0 %vm93_vm1, %v953_v55 }
  0xca   :  { %3749 = vmatmul.mubr.msk.bf16.vlgmr.msra.gmra.mrb[32].mxu1 %vm89_vm2, %v3745_v49  ;;  %1062 = vmatpush1.bf16.msra.mxu0 %v971_v58 }
  0xcb   :  { %3890 = vmatpush3.bf16.msra.mxu1 %v977_v57  ;;  %v1152_v59 = vpop.permute.xlu0 %1151  ;;  %v1154_v60 = vpop.permute.xlu1 %1153  ;;  %3891 = vmatprep.mubr.msk.bf16.mxu1 %vm3981_vm4, %v3979_v37 }
  0xcc   :  { %v1168_v61 = vsel %vm1167_vm8, %v1152_v59, %v1154_v60 }
  0xcd   :  { %v1179_v1 = vsel %vm93_vm1, %v1168_v61, 0 }
  0xce   :  { %3751 = vmatmul.mubr.msk.bf16.vlgmr.msra.gmra.mrb[36].mxu0 %vm89_vm2, %v3745_v49 }
  0xcf   :  { %v1156_v62 = vpop.permute.xlu0 %1155  ;;  %v1158_v63 = vpop.permute.xlu1 %1157  ;;  %1231 = vmatprep.mubr.bf16.mxu0 %v3970_v8 }
  0xd0   :  { %v1169_v0 = vsel %vm1167_vm8, %v1154_v60, %v1156_v62  ;;  %v1170_v2 = vsel %vm1167_vm8, %v1156_v62, %v1158_v63 }
  0xd1   :  { %3754 = vmatprep.subr.msk.bf16.mxu0 %vm93_vm1, %v1169_v0  ;;  %v1185_v9 = vsel %vm93_vm1, %v1170_v2, 0 }
  0xd2   :  { %3892 = vmatmul.mubr.msk.bf16.vlgmr.msra.gmra.mrb[36].mxu1 %vm89_vm2, %v3745_v49  ;;  %1200 = vmatpush1.bf16.msra.mxu0 %v1179_v1 }
  0xd3   :  { %v1160_v3 = vpop.permute.xlu0 %1159  ;;  %v1162_v5 = vpop.permute.xlu1 %1161  ;;  %1272 = vmatprep.mubr.bf16.mxu1 %v3970_v8 }
  0xd4   :  { %v1171_v7 = vsel %vm1167_vm8, %v1158_v63, %v1160_v3  ;;  %v1172_v10 = vsel %vm1167_vm8, %v1160_v3, %v1162_v5 }
  0xd5   :  { %3756 = vmatprep.subr.msk.bf16.mxu1 %vm93_vm1, %v1171_v7  ;;  %v1191_v15 = vsel %vm93_vm1, %v1172_v10, 0 }
  0xd6   :  { %3755 = vmatmul.mubr.msk.bf16.vlgmr.msra.gmra.mrb[40].mxu0 %vm89_vm2, %v3753_v6  ;;  %1241 = vmatpush1.bf16.msra.mxu1 %v1185_v9 }
  0xd7   :  { %v1164_v11 = vpop.permute.xlu0 %1163  ;;  %v1166_v12 = vpop.permute.xlu1 %1165  ;;  %3895 = vmatprep.subr.bf16.mxu1 %v3979_v37  ;;  %1313 = vmatprep.mubr.bf16.mxu0 %v3970_v8 }
  0xd8   :  { %v1173_v13 = vsel %vm1167_vm8, %v1162_v5, %v1164_v11  ;;  %v1174_v14 = vsel %vm1167_vm8, %v1164_v11, %v1166_v12  ;;  %v3777_v5 = vld [vmem:[%s4707_s1 + $0x20] sm:$0xf] }
  0xd9   :  { %v1197_v16 = vsel %vm93_vm1, %v1174_v14, 0  ;;  %3758 = vmatprep.subr.msk.bf16.mxu0 %vm93_vm1, %v1173_v13 }
  0xda   :  { %3757 = vmatmul.mubr.msk.bf16.vlgmr.msra.gmra.mrb[40].mxu1 %vm89_vm2, %v3753_v6  ;;  %1282 = vmatpush1.bf16.msra.mxu0 %v1191_v15 }
  0xdb   :  { %3896 = vmatpush3.bf16.msra.mxu1 %v1197_v16  ;;  %v1372_v17 = vpop.permute.xlu0 %1371  ;;  %v1374_v18 = vpop.permute.xlu1 %1373  ;;  %3897 = vmatprep.mubr.msk.bf16.mxu1 %vm3981_vm4, %v3979_v37 }
  0xdc   :  { %v1388_v20 = vsel %vm1387_vm9, %v1372_v17, %v1374_v18 }
  0xdd   :  { %v1399_v24 = vsel %vm93_vm1, %v1388_v20, 0 }
  0xde   :  { %3759 = vmatmul.mubr.msk.bf16.vlgmr.msra.gmra.mrb[44].mxu0 %vm89_vm2, %v3753_v6 }
  0xdf   :  { %v1376_v21 = vpop.permute.xlu0 %1375  ;;  %v1378_v22 = vpop.permute.xlu1 %1377  ;;  %1451 = vmatprep.mubr.bf16.mxu0 %v3970_v8 }
  0xe0   :  { %v1389_v23 = vsel %vm1387_vm9, %v1374_v18, %v1376_v21  ;;  %v1390_v25 = vsel %vm1387_vm9, %v1376_v21, %v1378_v22 }
  0xe1   :  { %3762 = vmatprep.subr.msk.bf16.mxu0 %vm93_vm1, %v1389_v23  ;;  %v1405_v30 = vsel %vm93_vm1, %v1390_v25, 0 }
  0xe2   :  { %3898 = vmatmul.mubr.msk.bf16.vlgmr.msra.gmra.mrb[44].mxu1 %vm89_vm2, %v3753_v6  ;;  %1420 = vmatpush1.bf16.msra.mxu0 %v1399_v24 }
  0xe3   :  { %v1380_v26 = vpop.permute.xlu0 %1379  ;;  %v1382_v27 = vpop.permute.xlu1 %1381  ;;  %1492 = vmatprep.mubr.bf16.mxu1 %v3970_v8 }
  0xe4   :  { %v1391_v29 = vsel %vm1387_vm9, %v1378_v22, %v1380_v26  ;;  %v1392_v31 = vsel %vm1387_vm9, %v1380_v26, %v1382_v27 }
  0xe5   :  { %3764 = vmatprep.subr.msk.bf16.mxu1 %vm93_vm1, %v1391_v29  ;;  %v1411_v36 = vsel %vm93_vm1, %v1392_v31, 0 }
  0xe6   :  { %3763 = vmatmul.mubr.msk.bf16.vlgmr.msra.gmra.mrb[48].mxu0 %vm89_vm2, %v3761_v28  ;;  %1461 = vmatpush1.bf16.msra.mxu1 %v1405_v30 }
  0xe7   :  { %v1384_v32 = vpop.permute.xlu0 %1383  ;;  %v1386_v33 = vpop.permute.xlu1 %1385  ;;  %3901 = vmatprep.subr.bf16.mxu1 %v3979_v37  ;;  %1533 = vmatprep.mubr.bf16.mxu0 %v3970_v8 }
  0xe8   :  { %v1393_v34 = vsel %vm1387_vm9, %v1382_v27, %v1384_v32  ;;  %v1394_v35 = vsel %vm1387_vm9, %v1384_v32, %v1386_v33 }
  0xe9   :  { %v1417_v38 = vsel %vm93_vm1, %v1394_v35, 0  ;;  %3766 = vmatprep.subr.msk.bf16.mxu0 %vm93_vm1, %v1393_v34 }
  0xea   :  { %3765 = vmatmul.mubr.msk.bf16.vlgmr.msra.gmra.mrb[48].mxu1 %vm89_vm2, %v3761_v28  ;;  %1502 = vmatpush1.bf16.msra.mxu0 %v1411_v36 }
  0xeb   :  { %3902 = vmatpush3.bf16.msra.mxu1 %v1417_v38  ;;  %v1592_v39 = vpop.permute.xlu0 %1591  ;;  %v1594_v40 = vpop.permute.xlu1 %1593  ;;  %3903 = vmatprep.mubr.msk.bf16.mxu1 %vm3981_vm4, %v3979_v37 }
  0xec   :  { %v1608_v41 = vsel %vm1607_vm10, %v1592_v39, %v1594_v40 }
  0xed   :  { %v1619_v45 = vsel %vm93_vm1, %v1608_v41, 0 }
  0xee   :  { %3767 = vmatmul.mubr.msk.bf16.vlgmr.msra.gmra.mrb[52].mxu0 %vm89_vm2, %v3761_v28 }
  0xef   :  { %v1596_v42 = vpop.permute.xlu0 %1595  ;;  %v1598_v43 = vpop.permute.xlu1 %1597  ;;  %1671 = vmatprep.mubr.bf16.mxu0 %v3970_v8 }
  0xf0   :  { %v1609_v44 = vsel %vm1607_vm10, %v1594_v40, %v1596_v42  ;;  %v1610_v46 = vsel %vm1607_vm10, %v1596_v42, %v1598_v43 }
  0xf1   :  { %3770 = vmatprep.subr.msk.bf16.mxu0 %vm93_vm1, %v1609_v44  ;;  %v1625_v51 = vsel %vm93_vm1, %v1610_v46, 0 }
  0xf2   :  { %3904 = vmatmul.mubr.msk.bf16.vlgmr.msra.gmra.mrb[52].mxu1 %vm89_vm2, %v3761_v28  ;;  %1640 = vmatpush1.bf16.msra.mxu0 %v1619_v45 }
  0xf3   :  { %v1600_v47 = vpop.permute.xlu0 %1599  ;;  %1712 = vmatprep.mubr.bf16.mxu1 %v3970_v8 }
  0xf4   :  { %v1611_v49 = vsel %vm1607_vm10, %v1598_v43, %v1600_v47  ;;  %v1602_v50 = vpop.permute.xlu1 %1601 }
  0xf5   :  { %3772 = vmatprep.subr.msk.bf16.mxu1 %vm93_vm1, %v1611_v49  ;;  %v1612_v52 = vsel %vm1607_vm10, %v1600_v47, %v1602_v50 }
  0xf6   :  { %3771 = vmatmul.mubr.msk.bf16.vlgmr.msra.gmra.mrb[56].mxu0 %vm89_vm2, %v3769_v48  ;;  %1681 = vmatpush1.bf16.msra.mxu1 %v1625_v51  ;;  %v1631_v56 = vsel %vm93_vm1, %v1612_v52, 0 }
  0xf7   :  { %v1604_v53 = vpop.permute.xlu0 %1603  ;;  %3907 = vmatprep.subr.bf16.mxu1 %v3979_v37  ;;  %1753 = vmatprep.mubr.bf16.mxu0 %v3970_v8 }
  0xf8   :  { %v1613_v54 = vsel %vm1607_vm10, %v1602_v50, %v1604_v53  ;;  %v1606_v55 = vpop.permute.xlu1 %1605 }
  0xf9   :  { %v1614_v57 = vsel %vm1607_vm10, %v1604_v53, %v1606_v55  ;;  %3774 = vmatprep.subr.msk.bf16.mxu0 %vm93_vm1, %v1613_v54 }
  0xfa   :  { %v1637_v58 = vsel %vm93_vm1, %v1614_v57, 0  ;;  %3773 = vmatmul.mubr.msk.bf16.vlgmr.msra.gmra.mrb[56].mxu1 %vm89_vm2, %v3769_v48  ;;  %1722 = vmatpush1.bf16.msra.mxu0 %v1631_v56 }
  0xfb   :  { %3908 = vmatpush3.bf16.msra.mxu1 %v1637_v58  ;;  %v1812_v59 = vpop.permute.xlu0 %1811  ;;  %3909 = vmatprep.mubr.msk.bf16.mxu1 %vm3981_vm4, %v3979_v37 }
  0xfc   :  { %v1814_v60 = vpop.permute.xlu1 %1813 }
  0xfd   :  { %v1828_v61 = vsel %vm1827_vm11, %v1812_v59, %v1814_v60 }
  0xfe   :  { %3775 = vmatmul.mubr.msk.bf16.vlgmr.msra.gmra.mrb[60].mxu0 %vm89_vm2, %v3769_v48  ;;  %v1839_v1 = vsel %vm93_vm1, %v1828_v61, 0 }
  0xff   :  { %v1816_v62 = vpop.permute.xlu0 %1815  ;;  %1891 = vmatprep.mubr.bf16.mxu0 %v3970_v8 }
 0x100   :  { %v1829_v63 = vsel %vm1827_vm11, %v1814_v60, %v1816_v62  ;;  %v1818_v0 = vpop.permute.xlu1 %1817 }
 0x101   :  { %3778 = vmatprep.subr.msk.bf16.mxu0 %vm93_vm1, %v1829_v63  ;;  %v1830_v2 = vsel %vm1827_vm11, %v1816_v62, %v1818_v0 }
 0x102   :  { %3910 = vmatmul.mubr.msk.bf16.vlgmr.msra.gmra.mrb[60].mxu1 %vm89_vm2, %v3769_v48  ;;  %1860 = vmatpush1.bf16.msra.mxu0 %v1839_v1  ;;  %v1845_v9 = vsel %vm93_vm1, %v1830_v2, 0 }
 0x103   :  { %v1820_v3 = vpop.permute.xlu0 %1819  ;;  %1932 = vmatprep.mubr.bf16.mxu1 %v3970_v8 }
 0x104   :  { %v1831_v6 = vsel %vm1827_vm11, %v1818_v0, %v1820_v3  ;;  %v1822_v7 = vpop.permute.xlu1 %1821 }
 0x105   :  { %3780 = vmatprep.subr.msk.bf16.mxu1 %vm93_vm1, %v1831_v6  ;;  %v1832_v10 = vsel %vm1827_vm11, %v1820_v3, %v1822_v7 }
 0x106   :  { %3779 = vmatmul.mubr.msk.bf16.vlgmr.msra.gmra.mrb[64].mxu0 %vm89_vm2, %v3777_v5  ;;  %1901 = vmatpush1.bf16.msra.mxu1 %v1845_v9  ;;  %v1851_v13 = vsel %vm93_vm1, %v1832_v10, 0 }
 0x107   :  { %v1824_v11 = vpop.permute.xlu0 %1823  ;;  %1973 = vmatprep.mubr.bf16.mxu0 %v3970_v8  ;;  %3913 = vmatprep.subr.bf16.mxu1 %v3979_v37 }
 0x108   :  { %v1833_v12 = vsel %vm1827_vm11, %v1822_v7, %v1824_v11 }
 0x109   :  { %3782 = vmatprep.subr.msk.bf16.mxu0 %vm93_vm1, %v1833_v12  ;;  %v1826_v14 = vpop.permute.xlu1 %1825 }
 0x10a   :  { %3781 = vmatmul.mubr.msk.bf16.vlgmr.msra.gmra.mrb[64].mxu1 %vm89_vm2, %v3777_v5  ;;  %1942 = vmatpush1.bf16.msra.mxu0 %v1851_v13  ;;  %v1834_v15 = vsel %vm1827_vm11, %v1824_v11, %v1826_v14 }
 0x10b   :  { %v1857_v16 = vsel %vm93_vm1, %v1834_v15, 0  ;;  %3915 = vmatprep.mubr.msk.bf16.mxu1 %vm3981_vm4, %v3979_v37  ;;  %vm2631_vm1 = vcmask 859136   ;;  %vm3150_vm4 = vcmask 711680  }
 0x10c   :  { %3914 = vmatpush3.bf16.msra.mxu1 %v1857_v16 }
 0x10e   :  { %3783 = vmatmul.mubr.msk.bf16.vlgmr.msra.gmra.mrb[68].mxu0 %vm89_vm2, %v3777_v5 }
 0x10f   :  { %2186 = vmatprep.mubr.bf16.mxu0 %v3970_v8 }
 0x112   :  { %3916 = vmatmul.mubr.msk.bf16.vlgmr.msra.gmra.mrb[68].mxu1 %vm89_vm2, %v3777_v5  ;;  %vm2804_vm2 = vcmask 850944  }
 0x113   :  { %2227 = vmatprep.mubr.bf16.mxu1 %v3970_v8 }
 0x158   :  { %v149_v17 = vpop.f32.mrb[0].mxu0 }
 0x159   :  { %v151_v18 = vpop.f32.mrb[1].mxu0 }
 0x15a   :  { %v153_v19 = vpop.f32.mrb[2].mxu0 }
 0x15b   :  { %v154_v20 = vpop.f32.mrb[3].mxu0 }
 0x15d   :  { %v190_v21 = vpop.f32.mrb[0].mxu1 }
 0x15e   :  { %v192_v22 = vpop.f32.mrb[1].mxu1 }
 0x15f   :  { %v194_v23 = vpop.f32.mrb[2].mxu1 }
 0x160   :  { %v195_v24 = vpop.f32.mrb[3].mxu1 }
 0x161   :  { %v231_v25 = vpop.f32.mrb[4].mxu0 }
 0x162   :  { %v233_v26 = vpop.f32.mrb[5].mxu0 }
 0x163   :  { %v235_v37 = vpop.f32.mrb[6].mxu0 }
 0x164   :  { %v236_v27 = vpop.f32.mrb[7].mxu0 }
 0x165   :  { %v272_v28 = vpop.f32.mrb[4].mxu1 }
 0x166   :  { %v3869_v29 = vpop.f32.mrb[5].mxu1 }
 0x167   :  { %v275_v30 = vpop.f32.mrb[6].mxu1 }
 0x168   :  { %v3870_v31 = vpop.f32.mrb[7].mxu1 }
 0x169   :  { %v360_v32 = vpop.f32.mrb[8].mxu0 }
 0x16a   :  { %v361_v33 = vadd.f32 %v360_v32, %v149_v17  ;;  %v362_v34 = vpop.f32.mrb[9].mxu0 }
 0x16b   :  { %v363_v35 = vadd.f32 %v362_v34, %v151_v18  ;;  %v364_v36 = vpop.f32.mrb[10].mxu0 }
 0x16c   :  { %v365_v38 = vpop.f32.mrb[11].mxu0 }
 0x16d   :  { %v401_v39 = vpop.f32.mrb[8].mxu1 }
 0x16e   :  { %v402_v40 = vadd.f32 %v401_v39, %v190_v21  ;;  %v403_v41 = vpop.f32.mrb[9].mxu1 }
 0x16f   :  { %v404_v42 = vadd.f32 %v403_v41, %v192_v22  ;;  %v405_v43 = vpop.f32.mrb[10].mxu1 }
 0x170   :  { %v406_v44 = vpop.f32.mrb[11].mxu1 }
 0x171   :  { %v442_v45 = vpop.f32.mrb[12].mxu0 }
 0x172   :  { %v443_v46 = vadd.f32 %v442_v45, %v231_v25  ;;  %v444_v47 = vpop.f32.mrb[13].mxu0 }
 0x173   :  { %v445_v48 = vadd.f32 %v444_v47, %v233_v26  ;;  %v446_v49 = vpop.f32.mrb[14].mxu0 }
 0x174   :  { %v447_v50 = vpop.f32.mrb[15].mxu0 }
 0x175   :  { %v483_v51 = vpop.f32.mrb[12].mxu1 }
 0x176   :  { %v484_v52 = vadd.f32 %v483_v51, %v272_v28  ;;  %v3875_v53 = vpop.f32.mrb[13].mxu1 }
 0x177   :  { %v486_v54 = vpop.f32.mrb[14].mxu1 }
 0x178   :  { %v3876_v55 = vpop.f32.mrb[15].mxu1 }
 0x179   :  { %v573_v56 = vpop.f32.mrb[16].mxu0 }
 0x17a   :  { %v702_v57 = vadd.f32 %v573_v56, %v361_v33  ;;  %v575_v58 = vpop.f32.mrb[17].mxu0 }
 0x17b   :  { %v703_v59 = vadd.f32 %v575_v58, %v363_v35  ;;  %v577_v60 = vpop.f32.mrb[18].mxu0 }
 0x17c   :  { %v578_v61 = vpop.f32.mrb[19].mxu0 }
 0x17d   :  { %v614_v62 = vpop.f32.mrb[16].mxu1 }
 0x17e   :  { %v704_v63 = vadd.f32 %v614_v62, %v402_v40  ;;  %v616_v0 = vpop.f32.mrb[17].mxu1 }
 0x17f   :  { %v705_v1 = vadd.f32 %v616_v0, %v404_v42  ;;  %v618_v2 = vpop.f32.mrb[18].mxu1 }
 0x180   :  { %v619_v3 = vpop.f32.mrb[19].mxu1 }
 0x181   :  { %v655_v5 = vpop.f32.mrb[20].mxu0 }
 0x182   :  { %v706_v6 = vadd.f32 %v655_v5, %v443_v46  ;;  %v657_v7 = vpop.f32.mrb[21].mxu0 }
 0x183   :  { %v707_v9 = vadd.f32 %v657_v7, %v445_v48  ;;  %v659_v10 = vpop.f32.mrb[22].mxu0 }
 0x184   :  { %v660_v11 = vpop.f32.mrb[23].mxu0 }
 0x185   :  { %v696_v12 = vpop.f32.mrb[20].mxu1 }
 0x186   :  { %v708_v13 = vadd.f32 %v696_v12, %v484_v52  ;;  %v3881_v14 = vpop.f32.mrb[21].mxu1 }
 0x187   :  { %v699_v15 = vpop.f32.mrb[22].mxu1 }
 0x188   :  { %v3882_v16 = vpop.f32.mrb[23].mxu1 }
 0x189   :  { %v793_v17 = vpop.f32.mrb[24].mxu0 }
 0x18a   :  { %v922_v18 = vadd.f32 %v793_v17, %v702_v57  ;;  %v795_v19 = vpop.f32.mrb[25].mxu0 }
 0x18b   :  { %v923_v20 = vadd.f32 %v795_v19, %v703_v59  ;;  %v797_v21 = vpop.f32.mrb[26].mxu0 }
 0x18c   :  { %v798_v22 = vpop.f32.mrb[27].mxu0 }
 0x18d   :  { %v834_v23 = vpop.f32.mrb[24].mxu1 }
 0x18e   :  { %v924_v24 = vadd.f32 %v834_v23, %v704_v63  ;;  %v836_v25 = vpop.f32.mrb[25].mxu1 }
 0x18f   :  { %v925_v26 = vadd.f32 %v836_v25, %v705_v1  ;;  %v838_v37 = vpop.f32.mrb[26].mxu1 }
 0x190   :  { %v839_v27 = vpop.f32.mrb[27].mxu1 }
 0x191   :  { %v875_v28 = vpop.f32.mrb[28].mxu0 }
 0x192   :  { %v926_v29 = vadd.f32 %v875_v28, %v706_v6  ;;  %v877_v30 = vpop.f32.mrb[29].mxu0 }
 0x193   :  { %v927_v31 = vadd.f32 %v877_v30, %v707_v9  ;;  %v879_v32 = vpop.f32.mrb[30].mxu0 }
 0x194   :  { %v880_v33 = vpop.f32.mrb[31].mxu0 }
 0x195   :  { %v916_v34 = vpop.f32.mrb[28].mxu1 }
 0x196   :  { %v928_v35 = vadd.f32 %v916_v34, %v708_v13  ;;  %v3887_v36 = vpop.f32.mrb[29].mxu1 }
 0x197   :  { %v919_v38 = vpop.f32.mrb[30].mxu1 }
 0x198   :  { %v3888_v39 = vpop.f32.mrb[31].mxu1 }
 0x199   :  { %v1013_v40 = vpop.f32.mrb[32].mxu0 }
 0x19a   :  { %v1142_v41 = vadd.f32 %v1013_v40, %v922_v18  ;;  %v1015_v42 = vpop.f32.mrb[33].mxu0 }
 0x19b   :  { %v1143_v43 = vadd.f32 %v1015_v42, %v923_v20  ;;  %v1017_v44 = vpop.f32.mrb[34].mxu0 }
 0x19c   :  { %v1018_v45 = vpop.f32.mrb[35].mxu0 }
 0x19d   :  { %v1054_v46 = vpop.f32.mrb[32].mxu1 }
 0x19e   :  { %v1144_v47 = vadd.f32 %v1054_v46, %v924_v24  ;;  %v1056_v48 = vpop.f32.mrb[33].mxu1 }
 0x19f   :  { %v1145_v49 = vadd.f32 %v1056_v48, %v925_v26  ;;  %v1058_v50 = vpop.f32.mrb[34].mxu1 }
 0x1a0   :  { %v1059_v51 = vpop.f32.mrb[35].mxu1 }
 0x1a1   :  { %v1095_v52 = vpop.f32.mrb[36].mxu0 }
 0x1a2   :  { %v1146_v53 = vadd.f32 %v1095_v52, %v926_v29  ;;  %v1097_v54 = vpop.f32.mrb[37].mxu0 }
 0x1a3   :  { %v1147_v55 = vadd.f32 %v1097_v54, %v927_v31  ;;  %v1099_v56 = vpop.f32.mrb[38].mxu0 }
 0x1a4   :  { %v1100_v57 = vpop.f32.mrb[39].mxu0 }
 0x1a5   :  { %v1136_v58 = vpop.f32.mrb[36].mxu1 }
 0x1a6   :  { %v1148_v59 = vadd.f32 %v1136_v58, %v928_v35  ;;  %v3893_v60 = vpop.f32.mrb[37].mxu1 }
 0x1a7   :  { %v1139_v61 = vpop.f32.mrb[38].mxu1 }
 0x1a8   :  { %v3894_v62 = vpop.f32.mrb[39].mxu1 }
 0x1a9   :  { %v1233_v63 = vpop.f32.mrb[40].mxu0 }
 0x1aa   :  { %v1362_v0 = vadd.f32 %v1233_v63, %v1142_v41  ;;  %v1235_v1 = vpop.f32.mrb[41].mxu0 }
 0x1ab   :  { %v1363_v2 = vadd.f32 %v1235_v1, %v1143_v43  ;;  %v1237_v3 = vpop.f32.mrb[42].mxu0 }
 0x1ac   :  { %v1238_v5 = vpop.f32.mrb[43].mxu0 }
 0x1ad   :  { %v1274_v6 = vpop.f32.mrb[40].mxu1 }
 0x1ae   :  { %v1364_v7 = vadd.f32 %v1274_v6, %v1144_v47  ;;  %v1276_v9 = vpop.f32.mrb[41].mxu1 }
 0x1af   :  { %v1365_v10 = vadd.f32 %v1276_v9, %v1145_v49  ;;  %v1278_v11 = vpop.f32.mrb[42].mxu1 }
 0x1b0   :  { %v1279_v12 = vpop.f32.mrb[43].mxu1  ;;  %v4395_v11 = vpop.permute.xlu0 %2032 }
 0x1b1   :  { %v1315_v13 = vpop.f32.mrb[44].mxu0 }
 0x1b2   :  { %v1366_v14 = vadd.f32 %v1315_v13, %v1146_v53  ;;  %v1317_v15 = vpop.f32.mrb[45].mxu0 }
 0x1b3   :  { %v1367_v16 = vadd.f32 %v1317_v15, %v1147_v55  ;;  %v1319_v17 = vpop.f32.mrb[46].mxu0 }
 0x1b4   :  { %v1320_v18 = vpop.f32.mrb[47].mxu0 }
 0x1b5   :  { %v1356_v19 = vpop.f32.mrb[44].mxu1 }
 0x1b6   :  { %v1368_v20 = vadd.f32 %v1356_v19, %v1148_v59  ;;  %v3899_v21 = vpop.f32.mrb[45].mxu1  ;;  %v2061_v19 = vsub.s32 2, %v4029_v4 }
 0x1b7   :  { %v1359_v22 = vpop.f32.mrb[46].mxu1 }
 0x1b8   :  { %v3900_v23 = vpop.f32.mrb[47].mxu1 }
 0x1b9   :  { %v1453_v24 = vpop.f32.mrb[48].mxu0 }
 0x1ba   :  { %v1582_v25 = vadd.f32 %v1453_v24, %v1362_v0  ;;  %v1455_v26 = vpop.f32.mrb[49].mxu0 }
 0x1bb   :  { %v1583_v37 = vadd.f32 %v1455_v26, %v1363_v2  ;;  %v1457_v27 = vpop.f32.mrb[50].mxu0 }
 0x1bc   :  { %v1458_v28 = vpop.f32.mrb[51].mxu0 }
 0x1bd   :  { %v1494_v29 = vpop.f32.mrb[48].mxu1 }
 0x1be   :  { %v1584_v30 = vadd.f32 %v1494_v29, %v1364_v7  ;;  %v1496_v31 = vpop.f32.mrb[49].mxu1  ;;  %v2053_v7 = vsub.s32 0, %v4029_v4  ;;  %v2057_v29 = vsub.s32 1, %v4029_v4 }
 0x1bf   :  { %v1585_v32 = vadd.f32 %v1496_v31, %v1365_v10  ;;  %v1498_v33 = vpop.f32.mrb[50].mxu1  ;;  %v4393_v10 = vld [vmem:[%s4709_s3] sm:$0x7f]  ;;  %s3982_s3 = smov 122  }
 0x1c0   :  { %v1499_v34 = vpop.f32.mrb[51].mxu1  ;;  %v2062_v27 = vrot.slane %v4393_v10, %v2061_v19 }
 0x1c1   :  { %v1535_v35 = vpop.f32.mrb[52].mxu0 }
 0x1c2   :  { %v1586_v36 = vadd.f32 %v1535_v35, %v1366_v14  ;;  %v1537_v38 = vpop.f32.mrb[53].mxu0 }
 0x1c3   :  { %v1587_v39 = vadd.f32 %v1537_v38, %v1367_v16  ;;  %v1539_v40 = vpop.f32.mrb[54].mxu0  ;;  %v2054_v16 = vrot.slane %v4393_v10, %v2053_v7 }
 0x1c4   :  { %v1540_v41 = vpop.f32.mrb[55].mxu0 }
 0x1c5   :  { %v1576_v42 = vpop.f32.mrb[52].mxu1  ;;  %v2058_v41 = vrot.slane %v4393_v10, %v2057_v29 }
 0x1c6   :  { %v1588_v43 = vadd.f32 %v1576_v42, %v1368_v20  ;;  %v3905_v44 = vpop.f32.mrb[53].mxu1  ;;  %v2065_v42 = vsub.s32 3, %v4029_v4 }
 0x1c7   :  { %v1579_v45 = vpop.f32.mrb[54].mxu1 }
 0x1c8   :  { %v3906_v46 = vpop.f32.mrb[55].mxu1 }
 0x1c9   :  { %v1673_v47 = vpop.f32.mrb[56].mxu0 }
 0x1ca   :  { %v1802_v48 = vadd.f32 %v1673_v47, %v1582_v25  ;;  %v1675_v49 = vpop.f32.mrb[57].mxu0 }
 0x1cb   :  { %v1803_v50 = vadd.f32 %v1675_v49, %v1583_v37  ;;  %v1677_v51 = vpop.f32.mrb[58].mxu0 }
 0x1cc   :  { %v1678_v52 = vpop.f32.mrb[59].mxu0  ;;  %v2069_v51 = vsub.s32 4, %v4029_v4 }
 0x1cd   :  { %v1714_v53 = vpop.f32.mrb[56].mxu1 }
 0x1ce   :  { %v1804_v54 = vadd.f32 %v1714_v53, %v1584_v30  ;;  %v1716_v55 = vpop.f32.mrb[57].mxu1 }
 0x1cf   :  { %v1805_v56 = vadd.f32 %v1716_v55, %v1585_v32  ;;  %v1718_v57 = vpop.f32.mrb[58].mxu1 }
 0x1d0   :  { %v1719_v58 = vpop.f32.mrb[59].mxu1  ;;  %v2077_v57 = vsub.s32 6, %v4029_v4 }
 0x1d1   :  { %v1755_v59 = vpop.f32.mrb[60].mxu0 }
 0x1d2   :  { %v1806_v60 = vadd.f32 %v1755_v59, %v1586_v36  ;;  %v1757_v61 = vpop.f32.mrb[61].mxu0 }
 0x1d3   :  { %v1807_v62 = vadd.f32 %v1757_v61, %v1587_v39  ;;  %v1759_v63 = vpop.f32.mrb[62].mxu0 }
 0x1d4   :  { %v1760_v0 = vpop.f32.mrb[63].mxu0  ;;  %v2078_v63 = vrot.slane %v4393_v10, %v2077_v57 }
 0x1d5   :  { %v1796_v1 = vpop.f32.mrb[60].mxu1 }
 0x1d6   :  { %v1808_v2 = vadd.f32 %v1796_v1, %v1588_v43  ;;  %v3911_v3 = vpop.f32.mrb[61].mxu1 }
 0x1d7   :  { %v1799_v5 = vpop.f32.mrb[62].mxu1 }
 0x1d8   :  { %v3912_v6 = vpop.f32.mrb[63].mxu1 }
 0x1d9   :  { %v1893_v9 = vpop.f32.mrb[64].mxu0 }
 0x1da   :  { %v2022_v12 = vadd.f32 %v1893_v9, %v1802_v48  ;;  %v1895_v13 = vpop.f32.mrb[65].mxu0 }
 0x1db   :  { %v2023_v14 = vadd.f32 %v1895_v13, %v1803_v50  ;;  %v1897_v15 = vpop.f32.mrb[66].mxu0 }
 0x1dc   :  { %v2035_v17 = vadd.f32 %v4395_v11, %v2022_v12  ;;  %v1898_v18 = vpop.f32.mrb[67].mxu0 }
 0x1dd   :  { %v1934_v20 = vpop.f32.mrb[64].mxu1  ;;  %v2036_v31 = vadd.f32 %v4395_v11, %v2023_v14 }
 0x1de   :  { %v2042_v21 = vmax.f32 %v2035_v17, 0.0  ;;  %v2024_v22 = vadd.f32 %v1934_v20, %v1804_v54  ;;  %v1936_v23 = vpop.f32.mrb[65].mxu1  ;;  %v2066_v54 = vrot.slane %v4393_v10, %v2065_v42  ;;  %v3653_v17 = vld [vmem:[%s4710_s5] sm:$0xf] }
 0x1df   :  { %v2025_v24 = vadd.f32 %v1936_v23, %v1805_v56  ;;  %v1938_v25 = vpop.f32.mrb[66].mxu1  ;;  %v2043_v44 = vmax.f32 %v2036_v31, 0.0  ;;  %v2070_v56 = vrot.slane %v4393_v10, %v2069_v51  ;;  %v3785_v23 = vld [vmem:[%s4711_s4 + $0x2] sm:$0x3] }
 0x1e0   :  { %v2086_v26 = vmul.f32 %v2054_v16, %v2042_v21  ;;  %v2037_v37 = vadd.f32 %v4395_v11, %v2024_v22  ;;  %v1939_v28 = vpop.f32.mrb[67].mxu1 }
 0x1e1   :  { %v1975_v30 = vpop.f32.mrb[68].mxu0  ;;  %v2038_v46 = vadd.f32 %v4395_v11, %v2025_v24  ;;  %v2087_v52 = vmul.f32 %v2058_v41, %v2043_v44 }
 0x1e2   :  { %v4404_v32 = vpack.c.bf16 %v2086_v26, %v2086_v26  ;;  %v2044_v33 = vmax.f32 %v2037_v37, 0.0  ;;  %v2026_v34 = vadd.f32 %v1975_v30, %v1806_v60  ;;  %v1977_v35 = vpop.f32.mrb[69].mxu0 }
 0x1e3   :  { %v2027_v36 = vadd.f32 %v1977_v35, %v1807_v62  ;;  %v1979_v38 = vpop.f32.mrb[70].mxu0  ;;  %v2045_v53 = vmax.f32 %v2038_v46, 0.0  ;;  %v4426_v58 = vpack.c.bf16 %v2087_v52, %v2087_v52  ;;  %v2073_v62 = vsub.s32 5, %v4029_v4 }
 0x1e4   :  { %v2088_v39 = vmul.f32 %v2062_v27, %v2044_v33  ;;  %2110 = vrot.lane.b32.xlu1 %v4404_v32, %s3982_s3  ;;  %v1980_v40 = vpop.f32.mrb[71].mxu0  ;;  %v2039_v55 = vadd.f32 %v4395_v11, %v2026_v34 }
 0x1e5   :  { %v2016_v43 = vpop.f32.mrb[68].mxu1  ;;  %v2089_v59 = vmul.f32 %v2066_v54, %v2045_v53  ;;  %v2074_v7 = vrot.slane %v4393_v10, %v2073_v62 }
 0x1e6   :  { %v4410_v45 = vpack.c.bf16 %v2088_v39, %v2088_v39  ;;  %v2028_v47 = vadd.f32 %v2016_v43, %v1808_v2  ;;  %v3917_v48 = vpop.f32.mrb[69].mxu1  ;;  %v2046_v60 = vmax.f32 %v2039_v55, 0.0  ;;  %v2040_v2 = vadd.f32 %v4395_v11, %v2027_v36  ;;  %v2100_v43 = vld [vmem:[%s4711_s4] sm:$0x3] }
 0x1e7   :  { %v2019_v49 = vpop.f32.mrb[70].mxu1  ;;  %v4435_v0 = vpack.c.bf16 %v2089_v59, %v2089_v59 }
 0x1e8   :  { %2277 = vrot.lane.b32.xlu1 %v4404_v32, %s3983_s28  ;;  %2114 = vrot.lane.b32.xlu0 %v4410_v45, %s3982_s3  ;;  %v3918_v50 = vpop.f32.mrb[71].mxu1  ;;  %v2041_v61 = vadd.f32 %v4395_v11, %v2028_v47  ;;  %v2090_v1 = vmul.f32 %v2070_v56, %v2046_v60  ;;  %v2047_v6 = vmax.f32 %v2040_v2, 0.0 }
 0x1ea   :  { %v2048_v3 = vmax.f32 %v2041_v61, 0.0  ;;  %v4442_v5 = vpack.c.bf16 %v2090_v1, %v2090_v1  ;;  %v2091_v9 = vmul.f32 %v2074_v7, %v2047_v6  ;;  %v3798_v61 = vld [vmem:[%s4711_s4 + $0x4] sm:$0x3] }
 0x1ec   :  { %2281 = vrot.lane.b32.xlu1 %v4410_v45, %s3983_s28  ;;  %2444 = vrot.lane.b32.xlu0 %v4404_v32, %s3984_s29  ;;  %v2092_v4 = vmul.f32 %v2078_v63, %v2048_v3  ;;  %v2098_v12 = vpack.c.bf16 %v2091_v9, %v2091_v9 }
 0x1ee   :  { %v4449_v11 = vpack.c.bf16 %v2092_v4, %v2092_v4 }
 0x1f0   :  { %2112 = vrot.lane.b32.xlu1 %v4426_v58, %s3982_s3  ;;  %2279 = vrot.lane.b32.xlu0 %v4426_v58, %s3983_s28 }
 0x1f4   :  { %2283 = vrot.lane.b32.xlu0 %v4435_v0, %s3983_s28  ;;  %2116 = vrot.lane.b32.xlu1 %v4435_v0, %s3982_s3 }
 0x1f8   :  { %2285 = vrot.lane.b32.xlu1 %v4442_v5, %s3983_s28  ;;  %2118 = vrot.lane.b32.xlu0 %v4442_v5, %s3982_s3 }
 0x1fc   :  { %2289 = vrot.lane.b32.xlu1 %v4449_v11, %s3983_s28  ;;  %2122 = vrot.lane.b32.xlu0 %v4449_v11, %s3982_s3 }
 0x200   :  { %2120 = vrot.lane.b32.xlu1 %v2098_v12, %s3982_s3  ;;  %2448 = vrot.lane.b32.xlu0 %v4410_v45, %s3984_s29 }
 0x204   :  { %2446 = vrot.lane.b32.xlu1 %v4426_v58, %s3984_s29  ;;  %2452 = vrot.lane.b32.xlu0 %v4442_v5, %s3984_s29 }
 0x208   :  { %2450 = vrot.lane.b32.xlu1 %v4435_v0, %s3984_s29  ;;  %2456 = vrot.lane.b32.xlu0 %v4449_v11, %s3984_s29 }
 0x20c   :  { %2617 = vrot.lane.b32.xlu1 %v4404_v32, %s3985_s30  ;;  %2619 = vrot.lane.b32.xlu0 %v4426_v58, %s3985_s30 }
 0x210   :  { %2621 = vrot.lane.b32.xlu1 %v4410_v45, %s3985_s30  ;;  %2287 = vrot.lane.b32.xlu0 %v2098_v12, %s3983_s28 }
 0x214   :  { %2625 = vrot.lane.b32.xlu1 %v4442_v5, %s3985_s30  ;;  %2623 = vrot.lane.b32.xlu0 %v4435_v0, %s3985_s30 }
 0x218   :  { %2454 = vrot.lane.b32.xlu1 %v2098_v12, %s3984_s29  ;;  %2790 = vrot.lane.b32.xlu0 %v4404_v32, %s3986_s7 }
 0x21c   :  { %2629 = vrot.lane.b32.xlu1 %v4449_v11, %s3985_s30  ;;  %2794 = vrot.lane.b32.xlu0 %v4410_v45, %s3986_s7 }
 0x220   :  { %2792 = vrot.lane.b32.xlu1 %v4426_v58, %s3986_s7  ;;  %2798 = vrot.lane.b32.xlu0 %v4442_v5, %s3986_s7 }
 0x224   :  { %2796 = vrot.lane.b32.xlu1 %v4435_v0, %s3986_s7  ;;  %2802 = vrot.lane.b32.xlu0 %v4449_v11, %s3986_s7 }
 0x228   :  { %2963 = vrot.lane.b32.xlu1 %v4404_v32, %s3987_s8  ;;  %2627 = vrot.lane.b32.xlu0 %v2098_v12, %s3985_s30 }
 0x22c   :  { %2967 = vrot.lane.b32.xlu1 %v4410_v45, %s3987_s8  ;;  %2965 = vrot.lane.b32.xlu0 %v4426_v58, %s3987_s8 }
 0x230   :  { %2800 = vrot.lane.b32.xlu1 %v2098_v12, %s3986_s7  ;;  %2969 = vrot.lane.b32.xlu0 %v4435_v0, %s3987_s8 }
 0x234   :  { %2971 = vrot.lane.b32.xlu1 %v4442_v5, %s3987_s8  ;;  %3136 = vrot.lane.b32.xlu0 %v4404_v32, %s3988_s9 }
 0x238   :  { %2975 = vrot.lane.b32.xlu1 %v4449_v11, %s3987_s8  ;;  %3140 = vrot.lane.b32.xlu0 %v4410_v45, %s3988_s9 }
 0x23c   :  { %3138 = vrot.lane.b32.xlu1 %v4426_v58, %s3988_s9  ;;  %3144 = vrot.lane.b32.xlu0 %v4442_v5, %s3988_s9 }
 0x240   :  { %3142 = vrot.lane.b32.xlu1 %v4435_v0, %s3988_s9  ;;  %2973 = vrot.lane.b32.xlu0 %v2098_v12, %s3987_s8 }
 0x244   :  { %3309 = vrot.lane.b32.xlu1 %v4404_v32, %s3989_s10  ;;  %3148 = vrot.lane.b32.xlu0 %v4449_v11, %s3988_s9 }
 0x248   :  { %3146 = vrot.lane.b32.xlu1 %v2098_v12, %s3988_s9  ;;  %3311 = vrot.lane.b32.xlu0 %v4426_v58, %s3989_s10 }
 0x24c   :  { %3313 = vrot.lane.b32.xlu1 %v4410_v45, %s3989_s10  ;;  %3315 = vrot.lane.b32.xlu0 %v4435_v0, %s3989_s10 }
 0x250   :  { %3317 = vrot.lane.b32.xlu1 %v4442_v5, %s3989_s10  ;;  %3482 = vrot.lane.b32.xlu0 %v4404_v32, %s3990_s11 }
 0x254   :  { %3321 = vrot.lane.b32.xlu1 %v4449_v11, %s3989_s10  ;;  %3486 = vrot.lane.b32.xlu0 %v4410_v45, %s3990_s11 }
 0x256   :  { %v2111_v10 = vpop.permute.xlu1 %2110 }
 0x258   :  { %3484 = vrot.lane.b32.xlu1 %v4426_v58, %s3990_s11  ;;  %3319 = vrot.lane.b32.xlu0 %v2098_v12, %s3989_s10 }
 0x25a   :  { %v2115_v13 = vpop.permute.xlu0 %2114  ;;  %v2278_v14 = vpop.permute.xlu1 %2277 }
 0x25c   :  { %3488 = vrot.lane.b32.xlu1 %v4435_v0, %s3990_s11  ;;  %3490 = vrot.lane.b32.xlu0 %v4442_v5, %s3990_s11 }
 0x25e   :  { %v4503_v15 = vpop.permute.xlu0 %2444  ;;  %v2282_v16 = vpop.permute.xlu1 %2281 }
 0x260   :  { %3492 = vrot.lane.b32.xlu1 %v2098_v12, %s3990_s11  ;;  %3494 = vrot.lane.b32.xlu0 %v4449_v11, %s3990_s11 }
 0x262   :  { %v2280_v18 = vpop.permute.xlu0 %2279  ;;  %v2113_v19 = vpop.permute.xlu1 %2112 }
 0x263   :  { %v2125_v20 = vsel %vm2124_vm12, %v2111_v10, %v2113_v19  ;;  %v2126_v21 = vsel %vm2124_vm12, %v2113_v19, %v2115_v13  ;;  %v2292_v30 = vsel %vm2291_vm15, %v2278_v14, %v2280_v18  ;;  %v2293_v31 = vsel %vm2291_vm15, %v2280_v18, %v2282_v16  ;;  %v3805_v19 = vld [vmem:[%s4711_s4 + $0x6] sm:$0x3] }
 0x264   :  { %v2137_v22 = vsel %vm2135_vm13, %v2125_v20, 0  ;;  %3786 = vmatprep.subr.msk.bf16.mxu0 %vm2135_vm13, %v2126_v21  ;;  %3656 = vperm.xlu1 %3942, %v3653_v17   ;;  %v2302_v34 = vsel %vm2135_vm13, %v2292_v30, 0 }
 0x265   :  { %2155 = vmatpush1.bf16.msra.mxu0 %v2137_v22 }
 0x266   :  { %v2284_v24 = vpop.permute.xlu0 %2283  ;;  %v2117_v25 = vpop.permute.xlu1 %2116 }
 0x267   :  { %v2127_v26 = vsel %vm2124_vm12, %v2115_v13, %v2117_v25  ;;  %v2294_v41 = vsel %vm2291_vm15, %v2282_v16, %v2284_v24 }
 0x268   :  { %3787 = vmatmul.mubr.msk.bf16.vlgmr.msra.gmra.mrb[72].mxu0 %vm2131_vm14, %v3785_v23  ;;  %v2143_v29 = vsel %vm2135_vm13, %v2127_v26, 0  ;;  %v2308_v46 = vsel %vm2135_vm13, %v2294_v41, 0 }
 0x269   :  { %2268 = vmatprep.mubr.bf16.mxu0 %v3970_v8 }
 0x26a   :  { %v2119_v37 = vpop.permute.xlu0 %2118  ;;  %v2286_v27 = vpop.permute.xlu1 %2285 }
 0x26b   :  { %v2128_v28 = vsel %vm2124_vm12, %v2117_v25, %v2119_v37  ;;  %v2295_v42 = vsel %vm2291_vm15, %v2284_v24, %v2286_v27 }
 0x26c   :  { %3788 = vmatprep.subr.msk.bf16.mxu1 %vm2135_vm13, %v2128_v28 }
 0x26d   :  { %2196 = vmatpush1.bf16.msra.mxu1 %v2143_v29  ;;  %v3812_v29 = vld [vmem:[%s4711_s4 + $0x8] sm:$0x3] }
 0x26e   :  { %v2123_v32 = vpop.permute.xlu0 %2122  ;;  %3792 = vmatprep.subr.msk.bf16.mxu1 %vm2135_vm13, %v2293_v31  ;;  %v2290_v33 = vpop.permute.xlu1 %2289 }
 0x270   :  { %3789 = vmatmul.mubr.msk.bf16.vlgmr.msra.gmra.mrb[72].mxu1 %vm2131_vm14, %v3785_v23 }
 0x271   :  { %2320 = vmatpush1.bf16.msra.mxu1 %v2302_v34  ;;  %2351 = vmatprep.mubr.bf16.mxu1 %v3970_v8 }
 0x272   :  { %v2449_v35 = vpop.permute.xlu0 %2448  ;;  %v2121_v36 = vpop.permute.xlu1 %2120 }
 0x273   :  { %v2129_v38 = vsel %vm2124_vm12, %v2119_v37, %v2121_v36  ;;  %v2130_v39 = vsel %vm2124_vm12, %v2121_v36, %v2123_v32 }
 0x274   :  { %v2149_v40 = vsel %vm2135_vm13, %v2129_v38, 0  ;;  %3790 = vmatprep.subr.msk.bf16.mxu0 %vm2135_vm13, %v2130_v39 }
 0x275   :  { %2237 = vmatpush1.bf16.msra.mxu0 %v2149_v40 }
 0x276   :  { %v2453_v44 = vpop.permute.xlu0 %2452  ;;  %3794 = vmatprep.subr.msk.bf16.mxu0 %vm2135_vm13, %v2295_v42  ;;  %v2447_v45 = vpop.permute.xlu1 %2446 }
 0x277   :  { %v2460_v47 = vsel %vm2458_vm0, %v2447_v45, %v2449_v35  ;;  %v2459_v50 = vsel %vm2458_vm0, %v4503_v15, %v2447_v45 }
 0x278   :  { %3791 = vmatmul.mubr.msk.bf16.vlgmr.msra.gmra.mrb[76].mxu0 %vm2131_vm14, %v3785_v23  ;;  %3793 = vmatmul.mubr.msk.bf16.vlgmr.msra.gmra.mrb[76].mxu1 %vm2131_vm14, %v2100_v43  ;;  %v2469_v53 = vsel %vm2135_vm13, %v2459_v50, 0 }
 0x279   :  { %2361 = vmatpush1.bf16.msra.mxu0 %v2308_v46  ;;  %2392 = vmatprep.mubr.bf16.mxu0 %v3970_v8 }
 0x27a   :  { %v2457_v48 = vpop.permute.xlu0 %2456  ;;  %3799 = vmatprep.subr.msk.bf16.mxu0 %vm2135_vm13, %v2460_v47  ;;  %v2451_v49 = vpop.permute.xlu1 %2450  ;;  %2433 = vmatprep.mubr.bf16.mxu1 %v3970_v8 }
 0x27b   :  { %v2461_v59 = vsel %vm2458_vm0, %v2449_v35, %v2451_v49  ;;  %v2462_v60 = vsel %vm2458_vm0, %v2451_v49, %v2453_v44  ;;  %v3819_v49 = vld [vmem:[%s4711_s4 + $0xa] sm:$0x3] }
 0x27c   :  { %v2475_v0 = vsel %vm2135_vm13, %v2461_v59, 0 }
 0x27e   :  { %v2620_v51 = vpop.permute.xlu0 %2619  ;;  %v2618_v52 = vpop.permute.xlu1 %2617 }
 0x27f   :  { %v2632_v4 = vsel %vm2631_vm1, %v2618_v52, %v2620_v51 }
 0x280   :  { %3795 = vmatmul.mubr.msk.bf16.vlgmr.msra.gmra.mrb[80].mxu0 %vm2131_vm14, %v2100_v43  ;;  %v2642_v13 = vsel %vm2135_vm13, %v2632_v4, 0 }
 0x281   :  { %2487 = vmatpush1.bf16.msra.mxu0 %v2469_v53  ;;  %2518 = vmatprep.mubr.bf16.mxu0 %v3970_v8 }
 0x282   :  { %v2288_v54 = vpop.permute.xlu0 %2287  ;;  %v2622_v55 = vpop.permute.xlu1 %2621 }
 0x283   :  { %v2296_v56 = vsel %vm2291_vm15, %v2286_v27, %v2288_v54  ;;  %v2297_v57 = vsel %vm2291_vm15, %v2288_v54, %v2290_v33  ;;  %v2633_v1 = vsel %vm2631_vm1, %v2620_v51, %v2622_v55 }
 0x284   :  { %v2314_v58 = vsel %vm2135_vm13, %v2296_v56, 0  ;;  %3796 = vmatprep.subr.msk.bf16.mxu1 %vm2135_vm13, %v2297_v57 }
 0x285   :  { %2402 = vmatpush1.bf16.msra.mxu1 %v2314_v58 }
 0x286   :  { %v2624_v62 = vpop.permute.xlu0 %2623  ;;  %3801 = vmatprep.subr.msk.bf16.mxu1 %vm2135_vm13, %v2462_v60  ;;  %v2626_v63 = vpop.permute.xlu1 %2625 }
 0x287   :  { %v2634_v9 = vsel %vm2631_vm1, %v2622_v55, %v2624_v62  ;;  %v2635_v11 = vsel %vm2631_vm1, %v2624_v62, %v2626_v63  ;;  %v3826_v62 = vld [vmem:[%s4711_s4 + $0xc] sm:$0x3] }
 0x288   :  { %3797 = vmatmul.mubr.msk.bf16.vlgmr.msra.gmra.mrb[80].mxu1 %vm2131_vm14, %v2100_v43  ;;  %3800 = vmatmul.mubr.msk.bf16.vlgmr.msra.gmra.mrb[84].mxu0 %vm2131_vm14, %v3798_v61  ;;  %v2648_v14 = vsel %vm2135_vm13, %v2634_v9, 0 }
 0x289   :  { %2528 = vmatpush1.bf16.msra.mxu1 %v2475_v0  ;;  %2559 = vmatprep.mubr.bf16.mxu1 %v3970_v8 }
 0x28a   :  { %v2791_v2 = vpop.permute.xlu0 %2790  ;;  %3806 = vmatprep.subr.msk.bf16.mxu1 %vm2135_vm13, %v2633_v1  ;;  %v2455_v3 = vpop.permute.xlu1 %2454  ;;  %2600 = vmatprep.mubr.bf16.mxu0 %v3970_v8 }
 0x28b   :  { %v2463_v5 = vsel %vm2458_vm0, %v2453_v44, %v2455_v3  ;;  %v2464_v6 = vsel %vm2458_vm0, %v2455_v3, %v2457_v48 }
 0x28c   :  { %v2481_v7 = vsel %vm2135_vm13, %v2463_v5, 0  ;;  %3803 = vmatprep.subr.msk.bf16.mxu0 %vm2135_vm13, %v2464_v6 }
 0x28d   :  { %2569 = vmatpush1.bf16.msra.mxu0 %v2481_v7 }
 0x28e   :  { %v2795_v12 = vpop.permute.xlu0 %2794  ;;  %3808 = vmatprep.subr.msk.bf16.mxu0 %vm2135_vm13, %v2635_v11  ;;  %v2630_v10 = vpop.permute.xlu1 %2629 }
 0x290   :  { %3802 = vmatmul.mubr.msk.bf16.vlgmr.msra.gmra.mrb[84].mxu1 %vm2131_vm14, %v3798_v61  ;;  %3804 = vmatmul.mubr.msk.bf16.vlgmr.msra.gmra.mrb[88].mxu0 %vm2131_vm14, %v3798_v61 }
 0x291   :  { %2660 = vmatpush1.bf16.msra.mxu1 %v2642_v13  ;;  %2701 = vmatpush1.bf16.msra.mxu0 %v2648_v14 }
 0x292   :  { %v2799_v15 = vpop.permute.xlu0 %2798  ;;  %v2793_v16 = vpop.permute.xlu1 %2792  ;;  %2691 = vmatprep.mubr.bf16.mxu1 %v3970_v8  ;;  %2732 = vmatprep.mubr.bf16.mxu0 %v3970_v8 }
 0x293   :  { %v2806_v17 = vsel %vm2804_vm2, %v2793_v16, %v2795_v12  ;;  %v2805_v18 = vsel %vm2804_vm2, %v2791_v2, %v2793_v16 }
 0x294   :  { %3813 = vmatprep.subr.msk.bf16.mxu0 %vm2135_vm13, %v2806_v17  ;;  %v2815_v22 = vsel %vm2135_vm13, %v2805_v18, 0  ;;  %v3833_v18 = vld [vmem:[%s4711_s4 + $0xe] sm:$0x3] }
 0x296   :  { %v2803_v20 = vpop.permute.xlu0 %2802  ;;  %v2797_v21 = vpop.permute.xlu1 %2796 }
 0x297   :  { %v2807_v27 = vsel %vm2804_vm2, %v2795_v12, %v2797_v21  ;;  %v2808_v28 = vsel %vm2804_vm2, %v2797_v21, %v2799_v15 }
 0x298   :  { %3807 = vmatmul.mubr.msk.bf16.vlgmr.msra.gmra.mrb[88].mxu1 %vm2131_vm14, %v3805_v19  ;;  %3809 = vmatmul.mubr.msk.bf16.vlgmr.msra.gmra.mrb[92].mxu0 %vm2131_vm14, %v3805_v19  ;;  %v2821_v32 = vsel %vm2135_vm13, %v2807_v27, 0 }
 0x299   :  { %2833 = vmatpush1.bf16.msra.mxu0 %v2815_v22  ;;  %2773 = vmatprep.mubr.bf16.mxu1 %v3970_v8 }
 0x29a   :  { %v2628_v23 = vpop.permute.xlu0 %2627  ;;  %v2964_v24 = vpop.permute.xlu1 %2963  ;;  %2864 = vmatprep.mubr.bf16.mxu0 %v3970_v8 }
 0x29b   :  { %v2636_v25 = vsel %vm2631_vm1, %v2626_v63, %v2628_v23  ;;  %v2637_v26 = vsel %vm2631_vm1, %v2628_v23, %v2630_v10 }
 0x29c   :  { %v2654_v37 = vsel %vm2135_vm13, %v2636_v25, 0  ;;  %3810 = vmatprep.subr.msk.bf16.mxu1 %vm2135_vm13, %v2637_v26 }
 0x29d   :  { %2742 = vmatpush1.bf16.msra.mxu1 %v2654_v37 }
 0x29e   :  { %v2966_v30 = vpop.permute.xlu0 %2965  ;;  %3815 = vmatprep.subr.msk.bf16.mxu1 %vm2135_vm13, %v2808_v28  ;;  %v2968_v31 = vpop.permute.xlu1 %2967  ;;  %v3840_v28 = vld [vmem:[%s4711_s4 + $0x10] sm:$0x3] }
 0x29f   :  { %v2979_v33 = vsel %vm2977_vm3, %v2966_v30, %v2968_v31  ;;  %v2978_v40 = vsel %vm2977_vm3, %v2964_v24, %v2966_v30 }
 0x2a0   :  { %3811 = vmatmul.mubr.msk.bf16.vlgmr.msra.gmra.mrb[92].mxu1 %vm2131_vm14, %v3805_v19  ;;  %3814 = vmatmul.mubr.msk.bf16.vlgmr.msra.gmra.mrb[96].mxu0 %vm2131_vm14, %v3812_v29  ;;  %v2988_v45 = vsel %vm2135_vm13, %v2978_v40, 0 }
 0x2a1   :  { %2874 = vmatpush1.bf16.msra.mxu1 %v2821_v32  ;;  %2905 = vmatprep.mubr.bf16.mxu1 %v3970_v8 }
 0x2a2   :  { %v2970_v34 = vpop.permute.xlu0 %2969  ;;  %3820 = vmatprep.subr.msk.bf16.mxu1 %vm2135_vm13, %v2979_v33  ;;  %v2801_v35 = vpop.permute.xlu1 %2800  ;;  %2946 = vmatprep.mubr.bf16.mxu0 %v3970_v8 }
 0x2a3   :  { %v2809_v36 = vsel %vm2804_vm2, %v2799_v15, %v2801_v35  ;;  %v2810_v38 = vsel %vm2804_vm2, %v2801_v35, %v2803_v20  ;;  %v2980_v41 = vsel %vm2977_vm3, %v2968_v31, %v2970_v34 }
 0x2a4   :  { %v2827_v39 = vsel %vm2135_vm13, %v2809_v36, 0  ;;  %3817 = vmatprep.subr.msk.bf16.mxu0 %vm2135_vm13, %v2810_v38  ;;  %v2994_v46 = vsel %vm2135_vm13, %v2980_v41, 0 }
 0x2a5   :  { %2915 = vmatpush1.bf16.msra.mxu0 %v2827_v39 }
 0x2a6   :  { %v3137_v42 = vpop.permute.xlu0 %3136  ;;  %v2972_v43 = vpop.permute.xlu1 %2971 }
 0x2a7   :  { %v2981_v44 = vsel %vm2977_vm3, %v2970_v34, %v2972_v43 }
 0x2a8   :  { %3816 = vmatmul.mubr.msk.bf16.vlgmr.msra.gmra.mrb[96].mxu1 %vm2131_vm14, %v3812_v29  ;;  %3818 = vmatmul.mubr.msk.bf16.vlgmr.msra.gmra.mrb[100].mxu0 %vm2131_vm14, %v3812_v29 }
 0x2a9   :  { %3006 = vmatpush1.bf16.msra.mxu1 %v2988_v45  ;;  %3822 = vmatprep.subr.msk.bf16.mxu0 %vm2135_vm13, %v2981_v44 }
 0x2aa   :  { %3047 = vmatpush1.bf16.msra.mxu0 %v2994_v46  ;;  %v3141_v47 = vpop.permute.xlu0 %3140  ;;  %v2976_v48 = vpop.permute.xlu1 %2975  ;;  %3037 = vmatprep.mubr.bf16.mxu1 %v3970_v8 }
 0x2ab   :  { %3078 = vmatprep.mubr.bf16.mxu0 %v3970_v8 }
 0x2ae   :  { %v3145_v50 = vpop.permute.xlu0 %3144  ;;  %v3139_v51 = vpop.permute.xlu1 %3138 }
 0x2af   :  { %v3151_v52 = vsel %vm3150_vm4, %v3137_v42, %v3139_v51  ;;  %v3152_v53 = vsel %vm3150_vm4, %v3139_v51, %v3141_v47 }
 0x2b0   :  { %v3161_v54 = vsel %vm2135_vm13, %v3151_v52, 0  ;;  %3821 = vmatmul.mubr.msk.bf16.vlgmr.msra.gmra.mrb[100].mxu1 %vm2131_vm14, %v3819_v49  ;;  %3823 = vmatmul.mubr.msk.bf16.vlgmr.msra.gmra.mrb[104].mxu0 %vm2131_vm14, %v3819_v49 }
 0x2b1   :  { %3827 = vmatprep.subr.msk.bf16.mxu0 %vm2135_vm13, %v3152_v53  ;;  %3119 = vmatprep.mubr.bf16.mxu1 %v3970_v8 }
 0x2b2   :  { %3179 = vmatpush1.bf16.msra.mxu0 %v3161_v54  ;;  %v2974_v55 = vpop.permute.xlu0 %2973  ;;  %v3143_v56 = vpop.permute.xlu1 %3142  ;;  %3210 = vmatprep.mubr.bf16.mxu0 %v3970_v8 }
 0x2b3   :  { %v2982_v57 = vsel %vm2977_vm3, %v2972_v43, %v2974_v55  ;;  %v2983_v58 = vsel %vm2977_vm3, %v2974_v55, %v2976_v48  ;;  %v3153_v60 = vsel %vm3150_vm4, %v3141_v47, %v3143_v56  ;;  %v3154_v61 = vsel %vm3150_vm4, %v3143_v56, %v3145_v50 }
 0x2b4   :  { %v3000_v59 = vsel %vm2135_vm13, %v2982_v57, 0  ;;  %3824 = vmatprep.subr.msk.bf16.mxu1 %vm2135_vm13, %v2983_v58  ;;  %v3167_v1 = vsel %vm2135_vm13, %v3153_v60, 0 }
 0x2b5   :  { %3088 = vmatpush1.bf16.msra.mxu1 %v3000_v59 }
 0x2b6   :  { %v3149_v63 = vpop.permute.xlu0 %3148  ;;  %3829 = vmatprep.subr.msk.bf16.mxu1 %vm2135_vm13, %v3154_v61  ;;  %v3310_v0 = vpop.permute.xlu1 %3309 }
 0x2b8   :  { %3825 = vmatmul.mubr.msk.bf16.vlgmr.msra.gmra.mrb[104].mxu1 %vm2131_vm14, %v3819_v49  ;;  %3828 = vmatmul.mubr.msk.bf16.vlgmr.msra.gmra.mrb[108].mxu0 %vm2131_vm14, %v3826_v62 }
 0x2b9   :  { %3220 = vmatpush1.bf16.msra.mxu1 %v3167_v1  ;;  %3251 = vmatprep.mubr.bf16.mxu1 %v3970_v8 }
 0x2ba   :  { %v3312_v2 = vpop.permute.xlu0 %3311  ;;  %v3147_v3 = vpop.permute.xlu1 %3146  ;;  %3292 = vmatprep.mubr.bf16.mxu0 %v3970_v8 }
 0x2bb   :  { %v3155_v5 = vsel %vm3150_vm4, %v3145_v50, %v3147_v3  ;;  %v3156_v6 = vsel %vm3150_vm4, %v3147_v3, %v3149_v63  ;;  %v3324_v4 = vsel %vm3323_vm5, %v3310_v0, %v3312_v2 }
 0x2bc   :  { %v3173_v7 = vsel %vm2135_vm13, %v3155_v5, 0  ;;  %3831 = vmatprep.subr.msk.bf16.mxu0 %vm2135_vm13, %v3156_v6  ;;  %v3334_v10 = vsel %vm2135_vm13, %v3324_v4, 0 }
 0x2bd   :  { %3261 = vmatpush1.bf16.msra.mxu0 %v3173_v7 }
 0x2be   :  { %v3316_v9 = vpop.permute.xlu0 %3315  ;;  %v3314_v11 = vpop.permute.xlu1 %3313 }
 0x2bf   :  { %v3325_v12 = vsel %vm3323_vm5, %v3312_v2, %v3314_v11  ;;  %v3326_v13 = vsel %vm3323_vm5, %v3314_v11, %v3316_v9 }
 0x2c0   :  { %3830 = vmatmul.mubr.msk.bf16.vlgmr.msra.gmra.mrb[108].mxu1 %vm2131_vm14, %v3826_v62  ;;  %3832 = vmatmul.mubr.msk.bf16.vlgmr.msra.gmra.mrb[112].mxu0 %vm2131_vm14, %v3826_v62  ;;  %v3340_v17 = vsel %vm2135_vm13, %v3326_v13, 0 }
 0x2c1   :  { %3834 = vmatprep.subr.msk.bf16.mxu1 %vm2135_vm13, %v3325_v12  ;;  %3383 = vmatprep.mubr.bf16.mxu1 %v3970_v8 }
 0x2c2   :  { %3352 = vmatpush1.bf16.msra.mxu1 %v3334_v10  ;;  %v3483_v14 = vpop.permute.xlu0 %3482  ;;  %v3318_v15 = vpop.permute.xlu1 %3317  ;;  %3424 = vmatprep.mubr.bf16.mxu0 %v3970_v8 }
 0x2c3   :  { %v3327_v16 = vsel %vm3323_vm5, %v3316_v9, %v3318_v15 }
 0x2c4   :  { %3836 = vmatprep.subr.msk.bf16.mxu0 %vm2135_vm13, %v3327_v16 }
 0x2c5   :  { %3393 = vmatpush1.bf16.msra.mxu0 %v3340_v17 }
 0x2c6   :  { %v3487_v19 = vpop.permute.xlu0 %3486  ;;  %v3322_v20 = vpop.permute.xlu1 %3321 }
 0x2c8   :  { %3835 = vmatmul.mubr.msk.bf16.vlgmr.msra.gmra.mrb[112].mxu1 %vm2131_vm14, %v3833_v18  ;;  %3837 = vmatmul.mubr.msk.bf16.vlgmr.msra.gmra.mrb[116].mxu0 %vm2131_vm14, %v3833_v18 }
 0x2c9   :  { %3465 = vmatprep.mubr.bf16.mxu1 %v3970_v8  ;;  %3556 = vmatprep.mubr.bf16.mxu0 %v3970_v8 }
 0x2ca   :  { %v3320_v21 = vpop.permute.xlu0 %3319  ;;  %v3485_v22 = vpop.permute.xlu1 %3484 }
 0x2cb   :  { %v3328_v23 = vsel %vm3323_vm5, %v3318_v15, %v3320_v21  ;;  %v3329_v24 = vsel %vm3323_vm5, %v3320_v21, %v3322_v20  ;;  %v3497_v25 = vsel %vm3496_vm6, %v3483_v14, %v3485_v22  ;;  %v3498_v26 = vsel %vm3496_vm6, %v3485_v22, %v3487_v19 }
 0x2cc   :  { %v3346_v37 = vsel %vm2135_vm13, %v3328_v23, 0  ;;  %v3507_v27 = vsel %vm2135_vm13, %v3497_v25, 0  ;;  %3838 = vmatprep.subr.msk.bf16.mxu1 %vm2135_vm13, %v3329_v24  ;;  %3841 = vmatprep.subr.msk.bf16.mxu0 %vm2135_vm13, %v3498_v26 }
 0x2cd   :  { %3434 = vmatpush1.bf16.msra.mxu1 %v3346_v37  ;;  %3525 = vmatpush1.bf16.msra.mxu0 %v3507_v27 }
 0x2ce   :  { %v3491_v29 = vpop.permute.xlu0 %3490  ;;  %v3489_v30 = vpop.permute.xlu1 %3488 }
 0x2cf   :  { %v3499_v31 = vsel %vm3496_vm6, %v3487_v19, %v3489_v30  ;;  %v3500_v32 = vsel %vm3496_vm6, %v3489_v30, %v3491_v29 }
 0x2d0   :  { %v3513_v33 = vsel %vm2135_vm13, %v3499_v31, 0  ;;  %3839 = vmatmul.mubr.msk.bf16.vlgmr.msra.gmra.mrb[116].mxu1 %vm2131_vm14, %v3833_v18  ;;  %3842 = vmatmul.mubr.msk.bf16.vlgmr.msra.gmra.mrb[120].mxu0 %vm2131_vm14, %v3840_v28 }
 0x2d1   :  { %3843 = vmatprep.subr.msk.bf16.mxu1 %vm2135_vm13, %v3500_v32  ;;  %3597 = vmatprep.mubr.bf16.mxu1 %v3970_v8 }
 0x2d2   :  { %3566 = vmatpush1.bf16.msra.mxu1 %v3513_v33  ;;  %v3495_v34 = vpop.permute.xlu0 %3494  ;;  %v3493_v35 = vpop.permute.xlu1 %3492  ;;  %3638 = vmatprep.mubr.bf16.mxu0 %v3970_v8 }
 0x2d3   :  { %v3501_v36 = vsel %vm3496_vm6, %v3491_v29, %v3493_v35  ;;  %v3502_v38 = vsel %vm3496_vm6, %v3493_v35, %v3495_v34 }
 0x2d4   :  { %v3519_v39 = vsel %vm2135_vm13, %v3501_v36, 0  ;;  %3845 = vmatprep.subr.msk.bf16.mxu0 %vm2135_vm13, %v3502_v38 }
 0x2d5   :  { %3607 = vmatpush1.bf16.msra.mxu0 %v3519_v39 }
 0x2d8   :  { %3844 = vmatmul.mubr.msk.bf16.vlgmr.msra.gmra.mrb[120].mxu1 %vm2131_vm14, %v3840_v28  ;;  %3846 = vmatmul.mubr.msk.bf16.vlgmr.msra.gmra.mrb[124].mxu0 %vm2131_vm14, %v3840_v28 }
 0x33b   :  { %v2188_v40 = vpop.f32.mrb[72].mxu0 }
 0x33c   :  { %v2190_v41 = vpop.f32.mrb[73].mxu0 }
 0x33d   :  { %v2192_v42 = vpop.f32.mrb[74].mxu0 }
 0x33e   :  { %v2193_v43 = vpop.f32.mrb[75].mxu0 }
 0x343   :  { %v2229_v44 = vpop.f32.mrb[72].mxu1 }
 0x344   :  { %v2231_v45 = vpop.f32.mrb[73].mxu1 }
 0x345   :  { %v2233_v8 = vpop.f32.mrb[74].mxu1 }
 0x346   :  { %v2234_v46 = vpop.f32.mrb[75].mxu1 }
 0x34b   :  { %v2353_v47 = vpop.f32.mrb[76].mxu1  ;;  %v2270_v48 = vpop.f32.mrb[76].mxu0 }
 0x34c   :  { %v2354_v49 = vadd.f32 %v2353_v47, %v2188_v40  ;;  %v2355_v50 = vpop.f32.mrb[77].mxu1  ;;  %v2272_v51 = vpop.f32.mrb[77].mxu0 }
 0x34d   :  { %v2356_v52 = vadd.f32 %v2355_v50, %v2190_v41  ;;  %v2274_v53 = vpop.f32.mrb[78].mxu0  ;;  %v2357_v54 = vpop.f32.mrb[78].mxu1 }
 0x34e   :  { %v2275_v55 = vpop.f32.mrb[79].mxu0  ;;  %v2358_v56 = vpop.f32.mrb[79].mxu1 }
 0x353   :  { %v2394_v57 = vpop.f32.mrb[80].mxu0 }
 0x354   :  { %v2395_v58 = vadd.f32 %v2394_v57, %v2229_v44  ;;  %v2396_v59 = vpop.f32.mrb[81].mxu0 }
 0x355   :  { %v2397_v60 = vadd.f32 %v2396_v59, %v2231_v45  ;;  %v2398_v61 = vpop.f32.mrb[82].mxu0 }
 0x356   :  { %v2399_v62 = vpop.f32.mrb[83].mxu0 }
 0x35b   :  { %v2435_v63 = vpop.f32.mrb[80].mxu1  ;;  %v2520_v0 = vpop.f32.mrb[84].mxu0 }
 0x35c   :  { %v2436_v1 = vadd.f32 %v2435_v63, %v2270_v48  ;;  %v2609_v2 = vadd.f32 %v2520_v0, %v2354_v49  ;;  %v2437_v3 = vpop.f32.mrb[81].mxu1  ;;  %v2522_v5 = vpop.f32.mrb[85].mxu0 }
 0x35d   :  { %v2438_v6 = vadd.f32 %v2437_v3, %v2272_v51  ;;  %v2610_v7 = vadd.f32 %v2522_v5, %v2356_v52  ;;  %v2439_v4 = vpop.f32.mrb[82].mxu1  ;;  %v2524_v9 = vpop.f32.mrb[86].mxu0 }
 0x35e   :  { %v2440_v11 = vpop.f32.mrb[83].mxu1  ;;  %v2525_v12 = vpop.f32.mrb[87].mxu0 }
 0x363   :  { %v2561_v10 = vpop.f32.mrb[84].mxu1  ;;  %v2602_v13 = vpop.f32.mrb[88].mxu0 }
 0x364   :  { %v2611_v14 = vadd.f32 %v2561_v10, %v2395_v58  ;;  %v2613_v15 = vadd.f32 %v2602_v13, %v2436_v1  ;;  %v2563_v16 = vpop.f32.mrb[85].mxu1  ;;  %v2604_v17 = vpop.f32.mrb[89].mxu0 }
 0x365   :  { %v2612_v18 = vadd.f32 %v2563_v16, %v2397_v60  ;;  %v2614_v19 = vadd.f32 %v2604_v17, %v2438_v6  ;;  %v2565_v20 = vpop.f32.mrb[86].mxu1  ;;  %v2606_v21 = vpop.f32.mrb[90].mxu0 }
 0x366   :  { %v2566_v22 = vpop.f32.mrb[87].mxu1  ;;  %v2607_v23 = vpop.f32.mrb[91].mxu0 }
 0x36b   :  { %v2693_v24 = vpop.f32.mrb[88].mxu1  ;;  %v2734_v25 = vpop.f32.mrb[92].mxu0 }
 0x36c   :  { %v2782_v26 = vadd.f32 %v2693_v24, %v2609_v2  ;;  %v2784_v37 = vadd.f32 %v2734_v25, %v2611_v14  ;;  %v2695_v27 = vpop.f32.mrb[89].mxu1  ;;  %v2736_v28 = vpop.f32.mrb[93].mxu0 }
 0x36d   :  { %v2783_v29 = vadd.f32 %v2695_v27, %v2610_v7  ;;  %v2785_v30 = vadd.f32 %v2736_v28, %v2612_v18  ;;  %v2697_v31 = vpop.f32.mrb[90].mxu1  ;;  %v2738_v32 = vpop.f32.mrb[94].mxu0 }
 0x36e   :  { %v2698_v33 = vpop.f32.mrb[91].mxu1  ;;  %v2739_v34 = vpop.f32.mrb[95].mxu0 }
 0x373   :  { %v2775_v35 = vpop.f32.mrb[92].mxu1  ;;  %v2866_v36 = vpop.f32.mrb[96].mxu0 }
 0x374   :  { %v2786_v38 = vadd.f32 %v2775_v35, %v2613_v15  ;;  %v2955_v39 = vadd.f32 %v2866_v36, %v2782_v26  ;;  %v2777_v40 = vpop.f32.mrb[93].mxu1  ;;  %v2868_v41 = vpop.f32.mrb[97].mxu0 }
 0x375   :  { %v2787_v42 = vadd.f32 %v2777_v40, %v2614_v19  ;;  %v2956_v43 = vadd.f32 %v2868_v41, %v2783_v29  ;;  %v2779_v44 = vpop.f32.mrb[94].mxu1  ;;  %v2870_v45 = vpop.f32.mrb[98].mxu0 }
 0x376   :  { %v2780_v8 = vpop.f32.mrb[95].mxu1  ;;  %v2871_v46 = vpop.f32.mrb[99].mxu0 }
 0x377   :  { %v3657_v44 = vpop.permute.xlu1 %3656 }
 0x37b   :  { %v2907_v47 = vpop.f32.mrb[96].mxu1  ;;  %v2948_v48 = vpop.f32.mrb[100].mxu0 }
 0x37c   :  { %v2957_v49 = vadd.f32 %v2907_v47, %v2784_v37  ;;  %v2959_v50 = vadd.f32 %v2948_v48, %v2786_v38  ;;  %v2909_v51 = vpop.f32.mrb[97].mxu1  ;;  %v2950_v52 = vpop.f32.mrb[101].mxu0 }
 0x37d   :  { %v2958_v53 = vadd.f32 %v2909_v51, %v2785_v30  ;;  %v2960_v54 = vadd.f32 %v2950_v52, %v2787_v42  ;;  %v2911_v55 = vpop.f32.mrb[98].mxu1  ;;  %v2952_v56 = vpop.f32.mrb[102].mxu0 }
 0x37e   :  { %v2912_v57 = vpop.f32.mrb[99].mxu1  ;;  %v2953_v58 = vpop.f32.mrb[103].mxu0 }
 0x383   :  { %v3039_v59 = vpop.f32.mrb[100].mxu1  ;;  %v3080_v60 = vpop.f32.mrb[104].mxu0 }
 0x384   :  { %v3128_v61 = vadd.f32 %v3039_v59, %v2955_v39  ;;  %v3130_v62 = vadd.f32 %v3080_v60, %v2957_v49  ;;  %v3041_v63 = vpop.f32.mrb[101].mxu1  ;;  %v3082_v0 = vpop.f32.mrb[105].mxu0 }
 0x385   :  { %v3129_v1 = vadd.f32 %v3041_v63, %v2956_v43  ;;  %v3131_v2 = vadd.f32 %v3082_v0, %v2958_v53  ;;  %v3043_v3 = vpop.f32.mrb[102].mxu1  ;;  %v3084_v5 = vpop.f32.mrb[106].mxu0 }
 0x386   :  { %v3044_v6 = vpop.f32.mrb[103].mxu1  ;;  %v3085_v7 = vpop.f32.mrb[107].mxu0 }
 0x38b   :  { %v3121_v4 = vpop.f32.mrb[104].mxu1  ;;  %v3212_v9 = vpop.f32.mrb[108].mxu0 }
 0x38c   :  { %v3132_v11 = vadd.f32 %v3121_v4, %v2959_v50  ;;  %v3301_v12 = vadd.f32 %v3212_v9, %v3128_v61  ;;  %v3123_v10 = vpop.f32.mrb[105].mxu1  ;;  %v3214_v13 = vpop.f32.mrb[109].mxu0 }
 0x38d   :  { %v3133_v14 = vadd.f32 %v3123_v10, %v2960_v54  ;;  %v3302_v15 = vadd.f32 %v3214_v13, %v3129_v1  ;;  %v3125_v16 = vpop.f32.mrb[106].mxu1  ;;  %v3216_v17 = vpop.f32.mrb[110].mxu0 }
 0x38e   :  { %v3126_v18 = vpop.f32.mrb[107].mxu1  ;;  %v3217_v19 = vpop.f32.mrb[111].mxu0 }
 0x393   :  { %v3253_v20 = vpop.f32.mrb[108].mxu1  ;;  %v3294_v21 = vpop.f32.mrb[112].mxu0 }
 0x394   :  { %v3303_v22 = vadd.f32 %v3253_v20, %v3130_v62  ;;  %v3305_v23 = vadd.f32 %v3294_v21, %v3132_v11  ;;  %v3255_v24 = vpop.f32.mrb[109].mxu1  ;;  %v3296_v25 = vpop.f32.mrb[113].mxu0 }
 0x395   :  { %v3304_v26 = vadd.f32 %v3255_v24, %v3131_v2  ;;  %v3306_v37 = vadd.f32 %v3296_v25, %v3133_v14  ;;  %v3257_v27 = vpop.f32.mrb[110].mxu1  ;;  %v3298_v28 = vpop.f32.mrb[114].mxu0 }
 0x396   :  { %v3258_v29 = vpop.f32.mrb[111].mxu1  ;;  %v3299_v30 = vpop.f32.mrb[115].mxu0 }
 0x39b   :  { %v3385_v31 = vpop.f32.mrb[112].mxu1  ;;  %v3426_v32 = vpop.f32.mrb[116].mxu0 }
 0x39c   :  { %v3474_v33 = vadd.f32 %v3385_v31, %v3301_v12  ;;  %v3476_v34 = vadd.f32 %v3426_v32, %v3303_v22  ;;  %v3387_v35 = vpop.f32.mrb[113].mxu1  ;;  %v3428_v36 = vpop.f32.mrb[117].mxu0 }
 0x39d   :  { %v3475_v38 = vadd.f32 %v3387_v35, %v3302_v15  ;;  %v3477_v39 = vadd.f32 %v3428_v36, %v3304_v26  ;;  %v3389_v40 = vpop.f32.mrb[114].mxu1  ;;  %v3430_v41 = vpop.f32.mrb[118].mxu0 }
 0x39e   :  { %v3390_v42 = vpop.f32.mrb[115].mxu1  ;;  %v3431_v43 = vpop.f32.mrb[119].mxu0 }
 0x3a3   :  { %v3467_v45 = vpop.f32.mrb[116].mxu1  ;;  %v3558_v8 = vpop.f32.mrb[120].mxu0 }
 0x3a4   :  { %v3478_v46 = vadd.f32 %v3467_v45, %v3305_v23  ;;  %v3647_v47 = vadd.f32 %v3558_v8, %v3474_v33  ;;  %v3469_v48 = vpop.f32.mrb[117].mxu1  ;;  %v3560_v49 = vpop.f32.mrb[121].mxu0 }
 0x3a5   :  { %v3479_v50 = vadd.f32 %v3469_v48, %v3306_v37  ;;  %v3648_v51 = vadd.f32 %v3560_v49, %v3475_v38  ;;  %v3471_v52 = vpop.f32.mrb[118].mxu1  ;;  %v3562_v53 = vpop.f32.mrb[122].mxu0 }
 0x3a6   :  { %v3659_v54 = vadd.f32 %v3657_v44, %v3647_v47  ;;  %v3472_v55 = vpop.f32.mrb[119].mxu1  ;;  %v3563_v56 = vpop.f32.mrb[123].mxu0 }
 0x3a7   :  { %v3660_v57 = vadd.f32 %v3657_v44, %v3648_v51 }
 0x3a8   :  { %v3665_v58 = vsub.f32 0.0, %v3659_v54 }
 0x3a9   :  { %v3666_v59 = vsub.f32 0.0, %v3660_v57 }
 0x3aa   :  { %v3671_v60 = vmul.f32 1.442695, %v3665_v58 }
 0x3ab   :  { %v3673_v61 = vmul.f32 1.442695, %v3666_v59  ;;  %v3599_v62 = vpop.f32.mrb[120].mxu1  ;;  %v3640_v63 = vpop.f32.mrb[124].mxu0 }
 0x3ac   :  { %3945 = vpow2.f32 %v3671_v60  ;;  %v3649_v0 = vadd.f32 %v3599_v62, %v3476_v34  ;;  %v3651_v1 = vadd.f32 %v3640_v63, %v3478_v46  ;;  %v3601_v2 = vpop.f32.mrb[121].mxu1  ;;  %v3642_v3 = vpop.f32.mrb[125].mxu0 }
 0x3ad   :  { %3947 = vpow2.f32 %v3673_v61  ;;  %v3650_v5 = vadd.f32 %v3601_v2, %v3477_v39  ;;  %v3652_v6 = vadd.f32 %v3642_v3, %v3479_v50  ;;  %v3603_v7 = vpop.f32.mrb[122].mxu1  ;;  %v3644_v4 = vpop.f32.mrb[126].mxu0 }
 0x3ae   :  { %v3661_v9 = vadd.f32 %v3657_v44, %v3649_v0  ;;  %v3663_v11 = vadd.f32 %v3657_v44, %v3651_v1  ;;  %v3604_v12 = vpop.f32.mrb[123].mxu1  ;;  %v3645_v10 = vpop.f32.mrb[127].mxu0 }
 0x3af   :  { %v3662_v13 = vadd.f32 %v3657_v44, %v3650_v5  ;;  %v3664_v14 = vadd.f32 %v3657_v44, %v3652_v6 }
 0x3b0   :  { %v3667_v15 = vsub.f32 0.0, %v3661_v9  ;;  %v3669_v16 = vsub.f32 0.0, %v3663_v11 }
 0x3b1   :  { %v3668_v17 = vsub.f32 0.0, %v3662_v13  ;;  %v3670_v18 = vsub.f32 0.0, %v3664_v14 }
 0x3b2   :  { %v3675_v19 = vmul.f32 1.442695, %v3667_v15  ;;  %v3679_v20 = vmul.f32 1.442695, %v3669_v16 }
 0x3b3   :  { %v3677_v21 = vmul.f32 1.442695, %v3668_v17  ;;  %v3681_v22 = vmul.f32 1.442695, %v3670_v18 }
 0x3b4   :  { %3949 = vpow2.f32 %v3675_v19 }
 0x3b5   :  { %3951 = vpow2.f32 %v3679_v20 }
 0x3b6   :  { %v3946_v23 = vpop.eup %3945  ;;  %3953 = vpow2.f32 %v3677_v21 }
 0x3b7   :  { %v3948_v24 = vpop.eup %3947  ;;  %v3683_v25 = vadd.f32 1.0, %v3946_v23  ;;  %3955 = vpow2.f32 %v3681_v22 }
 0x3b8   :  { %v3684_v26 = vadd.f32 1.0, %v3948_v24 }
 0x3b9   :  { %3957 = vrcp.f32 %v3683_v25 }
 0x3ba   :  { %3959 = vrcp.f32 %v3684_v26 }
 0x3be   :  { %v3950_v37 = vpop.eup %3949 }
 0x3bf   :  { %v3952_v27 = vpop.eup %3951  ;;  %v3685_v28 = vadd.f32 1.0, %v3950_v37 }
 0x3c0   :  { %v3954_v29 = vpop.eup %3953  ;;  %v3687_v30 = vadd.f32 1.0, %v3952_v27 }
 0x3c1   :  { %v3956_v31 = vpop.eup %3955  ;;  %3961 = vrcp.f32 %v3685_v28  ;;  %v3686_v32 = vadd.f32 1.0, %v3954_v29 }
 0x3c2   :  { %3963 = vrcp.f32 %v3687_v30  ;;  %v3688_v33 = vadd.f32 1.0, %v3956_v31 }
 0x3c3   :  { %v3958_v34 = vpop.eup %3957  ;;  %3965 = vrcp.f32 %v3686_v32 }
 0x3c4   :  { %v3960_v35 = vpop.eup %3959  ;;  %3967 = vrcp.f32 %v3688_v33 }
 0x3c5   :  { %v3701_v36 = vcombine.low %v3958_v34, %v3960_v35 }
 0x3c7   :  { %3707 = vst [vmem:[%s4712_s6] sm:$0xff] %v3701_v36 }
 0x3cb   :  { %v3962_v38 = vpop.eup %3961 }
 0x3cc   :  { %v3964_v39 = vpop.eup %3963 }
 0x3cd   :  { %v3966_v40 = vpop.eup %3965 }
 0x3ce   :  { %v3968_v41 = vpop.eup %3967  ;;  %v3702_v42 = vcombine.low %v3962_v38, %v3966_v40 }
 0x3cf   :  { %v3703_v43 = vcombine.low %v3964_v39, %v3968_v41 }
 0x3d0   :  { %3708 = vst [vmem:[%s4712_s6 + $0x8] sm:$0xff] %v3702_v42 }
 0x3d1   :  { %3709 = vst [vmem:[%s4712_s6 + $0x10] sm:$0xff] %v3703_v43 }

</bundles_post_ra>
